<compile_context>
chip_gen: v5e
topology: v5e:2x2
jax: 0.10.0
libtpu: 0.0.40
codegen_flags: <defaults>
</compile_context>

<pallas_src>
import jax
import jax.numpy as jnp
from jax.experimental import pallas as pl
from jax.experimental.pallas import tpu as pltpu

_LANE = 128  # lane-dense output width (action dim padded to a full vreg lane row)


def _round_up(n, m):
    return ((n + m - 1) // m) * m


def _actor_kernel(x_ref, w1_ref, b1_ref, w2_ref, b2_ref, w3_ref, b3_ref,
                  out_ref):
    """One batch tile: Linear->ReLU->Linear->(Dropout eval)->ReLU->Linear->Softmax."""
    x = x_ref[...]

    # Linear 1 + ReLU (MXU matmul, f32 accumulation)
    h1 = jnp.dot(x, w1_ref[...], preferred_element_type=jnp.float32) + b1_ref[...]
    h1 = jnp.maximum(h1, 0.0)

    # Linear 2 + Dropout(0.5) [eval mode => identity] + ReLU
    h2 = jnp.dot(h1, w2_ref[...], preferred_element_type=jnp.float32) + b2_ref[...]
    h2 = jnp.maximum(h2, 0.0)

    # Linear 3 -> logits (TB, 2)
    logits = jnp.dot(h2, w3_ref[...], preferred_element_type=jnp.float32) + b3_ref[...]

    # 2-class softmax in closed (sigmoid) form: avoids XLU cross-lane max/sum
    # over a width-2 axis, stays on VPU+EUP slots, and rows sum to exactly 1.
    d = logits[:, 1:2] - logits[:, 0:1]                    # (TB, 1)
    p1 = pl.reciprocal(1.0 + jnp.exp(-d), approx=False)    # sigmoid(d)
    p0 = 1.0 - p1

    # Lane-dense store: place [p0, p1] in lanes 0/1 of the 128-wide slab.
    lane = jax.lax.broadcasted_iota(jnp.int32, out_ref.shape, 1)
    out_ref[...] = jnp.where(lane == 0, p0, jnp.where(lane == 1, p1, 0.0))


def actor_forward(x, params, *, block_rows=256):
    """x: (batch, num_inputs) f32.  Returns probs: (batch, num_actions) f32."""
    w1, b1, w2, b2, w3, b3 = params
    batch, num_inputs = x.shape
    hidden = w1.shape[1]
    num_actions = w3.shape[1]
    assert num_actions == 2, "closed-form softmax path assumes 2 actions (CartPole)"
    # TODO(synk): >2 actions would need a generic masked-softmax path.

    # Batch tile: multiple of 8 sublanes, capped at block_rows. Pad batch so
    # the grid divides evenly (padded rows are zeros -> finite probs, discarded).
    tb = min(block_rows, _round_up(batch, 8))
    padded = _round_up(batch, tb)
    if padded != batch:
        x = jnp.pad(x, ((0, padded - batch), (0, 0)))
    grid = (padded // tb,)

    # Weights/biases stay VMEM-resident across all grid steps.
    def resident(arr):
        return pl.BlockSpec(arr.shape, lambda i: (0, 0))

    flops = 2 * padded * (num_inputs * hidden + hidden * hidden + hidden * num_actions)
    bytes_accessed = (x.size * 4
                      + sum(int(p.size) * 4 for p in params)
                      + padded * _LANE * 4)

    probs_padded = pl.pallas_call(
        _actor_kernel,
        out_shape=jax.ShapeDtypeStruct((padded, _LANE), jnp.float32),
        grid=grid,
        in_specs=[
            pl.BlockSpec((tb, num_inputs), lambda i: (i, 0)),
            resident(w1), resident(b1),
            resident(w2), resident(b2),
            resident(w3), resident(b3),
        ],
        out_specs=pl.BlockSpec((tb, _LANE), lambda i: (i, 0)),
        compiler_params=pltpu.CompilerParams(
            dimension_semantics=("parallel",)),
        cost_estimate=pl.CostEstimate(
            flops=flops, transcendentals=padded, bytes_accessed=bytes_accessed),
    )(x, w1, b1, w2, b2, w3, b3)

    return probs_padded[:batch, :num_actions]


def init_params(key, num_inputs, num_actions, hidden_size):
    """Deterministic PyTorch-Linear-style init (uniform ±1/sqrt(fan_in)).
    Weights are stored transposed: (in, out)."""
    def linear(key, fan_in, fan_out):
        kw, kb = jax.random.split(key)
        bound = 1.0 / (fan_in ** 0.5)
        w = jax.random.uniform(kw, (fan_in, fan_out), jnp.float32, -bound, bound)
        b = jax.random.uniform(kb, (1, fan_out), jnp.float32, -bound, bound)
        return w, b

    k1, k2, k3 = jax.random.split(key, 3)
    w1, b1 = linear(k1, num_inputs, hidden_size)
    w2, b2 = linear(k2, hidden_size, hidden_size)
    w3, b3 = linear(k3, hidden_size, num_actions)
    return (w1, b1, w2, b2, w3, b3)


if __name__ == "__main__":
    # CartPole-v0: observation dim = 4, actions = 2. Rollout-sized batch that
    # exercises both batch padding (500 -> 512) and a multi-step grid (2 tiles).
    num_inputs, num_actions, hidden_size = 4, 2, 32
    batch = 500

    key = jax.random.PRNGKey(0)
    k_params, k_x = jax.random.split(key)
    params = init_params(k_params, num_inputs, num_actions, hidden_size)
    x = jax.random.normal(k_x, (batch, num_inputs), jnp.float32)

    probs = jax.block_until_ready(actor_forward(x, params))

    # Pure-JAX reference (eval-mode semantics).
    w1, b1, w2, b2, w3, b3 = params
    h1 = jnp.maximum(x @ w1 + b1, 0.0)
    h2 = jnp.maximum(h1 @ w2 + b2, 0.0)
    ref = jax.nn.softmax(h2 @ w3 + b3, axis=-1)

    assert probs.shape == (batch, num_actions)
    assert bool(jnp.all(jnp.abs(jnp.sum(probs, axis=-1) - 1.0) < 1e-5))
    assert bool(jnp.max(jnp.abs(probs - ref)) < 1e-5)

    print("KERNEL_OK")
</pallas_src>

<mosaic_0001>
module attributes {stable_mosaic.version = 11 : i64} {
  func.func @_actor_kernel(%arg0: i32, %arg1: memref<256x4xf32, #tpu.memory_space<vmem>>, %arg2: memref<4x32xf32, #tpu.memory_space<vmem>>, %arg3: memref<1x32xf32, #tpu.memory_space<vmem>>, %arg4: memref<32x32xf32, #tpu.memory_space<vmem>>, %arg5: memref<1x32xf32, #tpu.memory_space<vmem>>, %arg6: memref<32x2xf32, #tpu.memory_space<vmem>>, %arg7: memref<1x2xf32, #tpu.memory_space<vmem>>, %arg8: memref<256x128xf32, #tpu.memory_space<vmem>>) attributes {dimension_semantics = [#tpu.dimension_semantics<parallel>], iteration_bounds = array<i64: 2>, scalar_prefetch = 0 : i64, scratch_operands = 0 : i64, tpu.core_type = #tpu.core_type<tc>, window_params = [{transform_indices = @transform_0, window_bounds = array<i64: 256, 4>}, {pipeline_mode = #tpu.pipeline_mode<synchronous>, transform_indices = @transform_1, window_bounds = array<i64: 4, 32>}, {pipeline_mode = #tpu.pipeline_mode<synchronous>, transform_indices = @transform_2, window_bounds = array<i64: 1, 32>}, {pipeline_mode = #tpu.pipeline_mode<synchronous>, transform_indices = @transform_3, window_bounds = array<i64: 32, 32>}, {pipeline_mode = #tpu.pipeline_mode<synchronous>, transform_indices = @transform_4, window_bounds = array<i64: 1, 32>}, {pipeline_mode = #tpu.pipeline_mode<synchronous>, transform_indices = @transform_5, window_bounds = array<i64: 32, 2>}, {pipeline_mode = #tpu.pipeline_mode<synchronous>, transform_indices = @transform_6, window_bounds = array<i64: 1, 2>}, {transform_indices = @transform_7, window_bounds = array<i64: 256, 128>}]} {
    %c0 = arith.constant 0 : index
    %c0_0 = arith.constant 0 : index
    %0 = vector.load %arg1[%c0, %c0_0] : memref<256x4xf32, #tpu.memory_space<vmem>>, vector<256x4xf32>
    %c0_1 = arith.constant 0 : index
    %c0_2 = arith.constant 0 : index
    %1 = vector.load %arg2[%c0_1, %c0_2] : memref<4x32xf32, #tpu.memory_space<vmem>>, vector<4x32xf32>
    %cst = arith.constant dense<0.000000e+00> : vector<256x32xf32>
    %2 = tpu.matmul %0, %1, %cst {dimension_numbers = #tpu.dot_dimension_numbers<[1], [0], [0], [1], [0, 0, 1, 1], [], []>} : vector<256x4xf32>, vector<4x32xf32>, vector<256x32xf32> -> vector<256x32xf32>
    %c0_3 = arith.constant 0 : index
    %c0_4 = arith.constant 0 : index
    %3 = vector.load %arg3[%c0_3, %c0_4] : memref<1x32xf32, #tpu.memory_space<vmem>>, vector<1x32xf32>
    %4 = vector.broadcast %3 : vector<1x32xf32> to vector<256x32xf32>
    %5 = arith.addf %2, %4 : vector<256x32xf32>
    %cst_5 = arith.constant 0.000000e+00 : f32
    %6 = vector.broadcast %cst_5 : f32 to vector<256x32xf32>
    %7 = arith.maximumf %5, %6 : vector<256x32xf32>
    %c0_6 = arith.constant 0 : index
    %c0_7 = arith.constant 0 : index
    %8 = vector.load %arg4[%c0_6, %c0_7] : memref<32x32xf32, #tpu.memory_space<vmem>>, vector<32x32xf32>
    %cst_8 = arith.constant dense<0.000000e+00> : vector<256x32xf32>
    %9 = tpu.matmul %7, %8, %cst_8 {dimension_numbers = #tpu.dot_dimension_numbers<[1], [0], [0], [1], [0, 0, 1, 1], [], []>} : vector<256x32xf32>, vector<32x32xf32>, vector<256x32xf32> -> vector<256x32xf32>
    %c0_9 = arith.constant 0 : index
    %c0_10 = arith.constant 0 : index
    %10 = vector.load %arg5[%c0_9, %c0_10] : memref<1x32xf32, #tpu.memory_space<vmem>>, vector<1x32xf32>
    %11 = vector.broadcast %10 : vector<1x32xf32> to vector<256x32xf32>
    %12 = arith.addf %9, %11 : vector<256x32xf32>
    %cst_11 = arith.constant 0.000000e+00 : f32
    %13 = vector.broadcast %cst_11 : f32 to vector<256x32xf32>
    %14 = arith.maximumf %12, %13 : vector<256x32xf32>
    %c0_12 = arith.constant 0 : index
    %c0_13 = arith.constant 0 : index
    %15 = vector.load %arg6[%c0_12, %c0_13] : memref<32x2xf32, #tpu.memory_space<vmem>>, vector<32x2xf32>
    %cst_14 = arith.constant dense<0.000000e+00> : vector<256x2xf32>
    %16 = tpu.matmul %14, %15, %cst_14 {dimension_numbers = #tpu.dot_dimension_numbers<[1], [0], [0], [1], [0, 0, 1, 1], [], []>} : vector<256x32xf32>, vector<32x2xf32>, vector<256x2xf32> -> vector<256x2xf32>
    %c0_15 = arith.constant 0 : index
    %c0_16 = arith.constant 0 : index
    %17 = vector.load %arg7[%c0_15, %c0_16] : memref<1x2xf32, #tpu.memory_space<vmem>>, vector<1x2xf32>
    %18 = vector.broadcast %17 : vector<1x2xf32> to vector<256x2xf32>
    %19 = arith.addf %16, %18 : vector<256x2xf32>
    %20 = vector.extract_strided_slice %19 {offsets = [0, 1], sizes = [256, 1], strides = [1, 1]} : vector<256x2xf32> to vector<256x1xf32>
    %21 = vector.extract_strided_slice %19 {offsets = [0, 0], sizes = [256, 1], strides = [1, 1]} : vector<256x2xf32> to vector<256x1xf32>
    %22 = arith.subf %20, %21 : vector<256x1xf32>
    %cst_17 = arith.constant 0.000000e+00 : f32
    %23 = vector.broadcast %cst_17 : f32 to vector<256x1xf32>
    %24 = arith.subf %23, %22 : vector<256x1xf32>
    %25 = math.exp %24 : vector<256x1xf32>
    %cst_18 = arith.constant 1.000000e+00 : f32
    %26 = vector.broadcast %cst_18 : f32 to vector<256x1xf32>
    %27 = arith.addf %26, %25 : vector<256x1xf32>
    %28 = tpu.reciprocal %27 : vector<256x1xf32> -> vector<256x1xf32>
    %cst_19 = arith.constant 1.000000e+00 : f32
    %29 = vector.broadcast %cst_19 : f32 to vector<256x1xf32>
    %30 = arith.subf %29, %28 : vector<256x1xf32>
    %31 = tpu.iota {dimensions = array<i32: 1>} : vector<256x128xi32>
    %c0_i32 = arith.constant 0 : i32
    %32 = vector.broadcast %c0_i32 : i32 to vector<256x128xi32>
    %33 = arith.cmpi eq, %31, %32 : vector<256x128xi32>
    %c1_i32 = arith.constant 1 : i32
    %34 = vector.broadcast %c1_i32 : i32 to vector<256x128xi32>
    %35 = arith.cmpi eq, %31, %34 : vector<256x128xi32>
    %cst_20 = arith.constant 0.000000e+00 : f32
    %36 = vector.shape_cast %28 : vector<256x1xf32> to vector<256x1xf32>
    %37 = vector.broadcast %36 : vector<256x1xf32> to vector<256x128xf32>
    %38 = vector.broadcast %cst_20 : f32 to vector<256x128xf32>
    %39 = arith.select %35, %37, %38 : vector<256x128xi1>, vector<256x128xf32>
    %40 = vector.shape_cast %30 : vector<256x1xf32> to vector<256x1xf32>
    %41 = vector.broadcast %40 : vector<256x1xf32> to vector<256x128xf32>
    %42 = arith.select %33, %41, %39 : vector<256x128xi1>, vector<256x128xf32>
    %c0_21 = arith.constant 0 : index
    %c0_22 = arith.constant 0 : index
    %43 = vector.load %arg8[%c0_21, %c0_22] : memref<256x128xf32, #tpu.memory_space<vmem>>, vector<256x128xf32>
    tpu.vector_store %arg8[%c0_21, %c0_22], %42 {strides = array<i32>} : memref<256x128xf32, #tpu.memory_space<vmem>>, vector<256x128xf32>,
    return
  }
  func.func @transform_0(%arg0: i32) -> (i32, i32) {
    %c0_i32 = arith.constant 0 : i32
    %c0_i32_0 = arith.constant 0 : i32
    return %arg0, %c0_i32 : i32, i32
  }
  func.func @transform_1(%arg0: i32) -> (i32, i32) {
    %c0_i32 = arith.constant 0 : i32
    %c0_i32_0 = arith.constant 0 : i32
    %c0_i32_1 = arith.constant 0 : i32
    return %c0_i32, %c0_i32_0 : i32, i32
  }
  func.func @transform_2(%arg0: i32) -> (i32, i32) {
    %c0_i32 = arith.constant 0 : i32
    %c0_i32_0 = arith.constant 0 : i32
    %c0_i32_1 = arith.constant 0 : i32
    return %c0_i32, %c0_i32_0 : i32, i32
  }
  func.func @transform_3(%arg0: i32) -> (i32, i32) {
    %c0_i32 = arith.constant 0 : i32
    %c0_i32_0 = arith.constant 0 : i32
    %c0_i32_1 = arith.constant 0 : i32
    return %c0_i32, %c0_i32_0 : i32, i32
  }
  func.func @transform_4(%arg0: i32) -> (i32, i32) {
    %c0_i32 = arith.constant 0 : i32
    %c0_i32_0 = arith.constant 0 : i32
    %c0_i32_1 = arith.constant 0 : i32
    return %c0_i32, %c0_i32_0 : i32, i32
  }
  func.func @transform_5(%arg0: i32) -> (i32, i32) {
    %c0_i32 = arith.constant 0 : i32
    %c0_i32_0 = arith.constant 0 : i32
    %c0_i32_1 = arith.constant 0 : i32
    return %c0_i32, %c0_i32_0 : i32, i32
  }
  func.func @transform_6(%arg0: i32) -> (i32, i32) {
    %c0_i32 = arith.constant 0 : i32
    %c0_i32_0 = arith.constant 0 : i32
    %c0_i32_1 = arith.constant 0 : i32
    return %c0_i32, %c0_i32_0 : i32, i32
  }
  func.func @transform_7(%arg0: i32) -> (i32, i32) {
    %c0_i32 = arith.constant 0 : i32
    %c0_i32_0 = arith.constant 0 : i32
    return %arg0, %c0_i32 : i32, i32
  }
}

</mosaic_0001>

<bundles_post_ra>
// kernel: tpu_custom_call.1
= control target key start
LH: loop header
LB: loop body
LE: loop exit
PB: predicated region body
PF: predicated region fallthrough
CT: control target
= control target key end

     0   :  { %12 = vsyncpa [#allocation3], 0  ;;  %s3631_s0 = inlined_call_operand.vmem [shape: f32[512,4], index: 0, kind: input, shape index: {}]   ;;  %s3632_s1 = inlined_call_operand.vmem [shape: f32[4,32], index: 1, kind: input, shape index: {}]   ;;  %s3633_s2 = inlined_call_operand.vmem [shape: f32[1,32], index: 2, kind: input, shape index: {}]   ;;  %s3634_s3 = inlined_call_operand.vmem [shape: f32[32,32], index: 3, kind: input, shape index: {}]   ;;  %s3635_s4 = inlined_call_operand.vmem [shape: f32[1,32], index: 4, kind: input, shape index: {}]   ;;  %s3636_s5 = inlined_call_operand.vmem [shape: f32[32,2], index: 5, kind: input, shape index: {}]   ;;  %s3637_s6 = inlined_call_operand.vmem [shape: f32[1,2], index: 6, kind: input, shape index: {}]   ;;  %s3638_s7 = inlined_call_operand.hbm [shape: f32[512,128], index: 7, kind: output, shape index: {}]  }
   0x1   :  { %14 = vsyncpa [#allocation3 + $0x1], 0  ;;  %s2701_s24 = smov 0   ;;  %s2703_s25 = smov 0  }
   0x2   :  { %s2705_s26 = smov 0   ;;  %s2707_s27 = smov 0  }
   0x3 LB: > { %s2722_s28 = sadd.s32 4294967295, %s2655_s27   ;;  %s2296_s29 = sadd.s32 4294967294, %s2655_s27   ;;  %s2655_s27 = sphi %s2707_s27, %s3654_s27   ;;  %s2651_s26 = sphi %s2705_s26, %s3653_s26   ;;  %s2647_s25 = sphi %s2703_s25, %s3652_s25   ;;  %s2643_s24 = sphi %s2701_s24, %s3651_s24  }
   0x4   : > { %s2726_s30 = sadd.s32 1, %s2655_s27   ;;  %s179_s8 = sadd.s32 1, %s2651_s26 }
   0x5   : > { %s176_s9 = ssub.s32 %s2655_s27, %s2726_s30  ;;  %p189_p0 = scmp.ne.s32.totalorder %s2651_s26, %s2647_s25 }
   0x6   : > { %p177_p1 = scmp.eq.s32.totalorder %s176_s9, 0  ;;  %p190_p2 = scmp.eq.s32.totalorder %s2722_s28, 1 }
   0x7   : > { %p195_p3 = scmp.ne.s32.totalorder %s2647_s25, %s2643_s24  ;;  %p196_p4 = scmp.eq.s32.totalorder %s2296_s29, 1 }
   0x8   : > { %s2737_s10 = scalar_select %p177_p1, %s2651_s26, %s179_s8  }
   0x9   : > { %p2739_p5 = por %p190_p2, %p189_p0  ;;  %p2743_p6 = por %p196_p4, %p195_p3 }
   0xa   : > { %p2299_p7 = scmp.ge.s32.totalorder %s2655_s27, 1  ;;  %p241_p8 = scmp.lt.s32.totalorder %s2655_s27, 3 }
   0xc   : > { %p242_p9 = pnand %p2299_p7, %p241_p8 }
   0xd   : > { %s2301_s15 = sshll.u32 (!%p242_p9), %s2722_s28, 5  ;;  %s2657_s14 = smov (!%p242_p9), 1  }
   0xe   : > { %245 = sbr.rel (%p242_p9) target bundleno = 954 (0x3ba), region = 48  ;;  %p274_p10 = scmp.lt.s32.totalorder (!%p242_p9), %s2301_s15, 63 }
   0xf   : > { %s2613_s18 = scalar_lea.hbm (!%p242_p9), %s3638_s7, 512 }
  0x13   : > { %v312_v0 = vld [vmem:[%s3632_s1] sm:$0xf]  ;;  %vm414_vm0 = vcmask 1043456   ;;  %s3656_s15 = smov (!%p274_p10, %s2301_s15), 63  ;;  %vm317_vm1 = vcmask 31744   ;;  %v566_v13 = vld [vmem:[%s3634_s3 + $0x18] sm:$0xff] }
  0x14   : > { %2303 = vmatpush.msk.msra.mxu0 %vm414_vm0, %v312_v0  ;;  %2406 = vmatpush.msk.msra.mxu3 %vm414_vm0, %v312_v0  ;;  %s2302_s16 = sshll.u32 %s3656_s15, 3  ;;  %v565_v14 = vld [vmem:[%s3634_s3 + $0x10] sm:$0xff]  ;;  %v564_v16 = vld [vmem:[%s3634_s3 + $0x8] sm:$0xff]  ;;  %v563_v17 = vld [vmem:[%s3634_s3] sm:$0xff]  ;;  %vm571_vm2 = vcmask 261120   ;;  %s270_s15 = sand.u32 1, %s2647_s25  }
  0x15   : > { %s2756_s19 = scalar_lea.vmem %s3631_s0, %s2302_s16  ;;  %680 = vmatpush.msra.mxu1 %v566_v13  ;;  %v2805_v21 = vld [vmem:[%s3633_s2] ss:$0 sm:$0xff]  ;;  %s2300_s16 = sshll.u32 %s270_s15, 8 }
  0x16   : > { %v280_v1 = vld [vmem:[%s2756_s19] sm:$0xff]  ;;  %v281_v2 = vld [vmem:[%s2756_s19 + $0x8] sm:$0xff]  ;;  %v282_v3 = vld [vmem:[%s2756_s19 + $0x10] sm:$0xff]  ;;  %2407 = vmatpush.msrb.mxu3 %v566_v13  ;;  %s3267_s17 = scalar_lea.vmem [#allocation2], %s2300_s16 }
  0x17   : > { %2304 = vmatmul.msk.f32.vlgmr.msra.gmra.mxu0 %vm317_vm1, %v280_v1  ;;  %v283_v4 = vld [vmem:[%s2756_s19 + $0x18] sm:$0xff]  ;;  %v284_v5 = vld [vmem:[%s2756_s19 + $0x20] sm:$0xff]  ;;  %v285_v6 = vld [vmem:[%s2756_s19 + $0x28] sm:$0xff]  ;;  %681 = vmatpush.msra.mxu1 %v565_v14  ;;  %s2231_s29 = sshll.u32 %s3267_s17, 4  ;;  %s2232_s29 = int_to_ptr.vmem [resolvable:$true] %s2231_s29 }
  0x18   : > { %v286_v7 = vld [vmem:[%s2756_s19 + $0x30] sm:$0xff]  ;;  %v287_v8 = vld [vmem:[%s2756_s19 + $0x38] sm:$0xff]  ;;  %v288_v9 = vld [vmem:[%s2756_s19 + $0x40] sm:$0xff]  ;;  %2408 = vmatpush.msrb.mxu3 %v565_v14 }
  0x19   : > { %v289_v10 = vld [vmem:[%s2756_s19 + $0x48] sm:$0xff]  ;;  %v290_v11 = vld [vmem:[%s2756_s19 + $0x50] sm:$0xff]  ;;  %v291_v12 = vld [vmem:[%s2756_s19 + $0x58] sm:$0xff]  ;;  %682 = vmatpush.msra.mxu1 %v564_v16 }
  0x1a   : > { %v292_v15 = vld [vmem:[%s2756_s19 + $0x60] sm:$0xff]  ;;  %2409 = vmatpush.msrb.mxu3 %v564_v16  ;;  %v293_v18 = vld [vmem:[%s2756_s19 + $0x68] sm:$0xff]  ;;  %v294_v19 = vld [vmem:[%s2756_s19 + $0x70] sm:$0xff] }
  0x1b   : > { %683 = vmatpush.msra.mxu1 %v563_v17  ;;  %v295_v20 = vld [vmem:[%s2756_s19 + $0x78] sm:$0xff]  ;;  %v296_v23 = vld [vmem:[%s2756_s19 + $0x80] sm:$0xff]  ;;  %v297_v27 = vld [vmem:[%s2756_s19 + $0x88] sm:$0xff] }
  0x1c   : > { %2410 = vmatpush.msrb.mxu3 %v563_v17  ;;  %v298_v31 = vld [vmem:[%s2756_s19 + $0x90] sm:$0xff]  ;;  %v299_v35 = vld [vmem:[%s2756_s19 + $0x98] sm:$0xff]  ;;  %v300_v39 = vld [vmem:[%s2756_s19 + $0xa0] sm:$0xff] }
  0x1d   : > { %v301_v43 = vld [vmem:[%s2756_s19 + $0xa8] sm:$0xff]  ;;  %v302_v48 = vld [vmem:[%s2756_s19 + $0xb0] sm:$0xff]  ;;  %v303_v53 = vld [vmem:[%s2756_s19 + $0xb8] sm:$0xff] }
  0x1e   : > { %v305_v45 = vld [vmem:[%s2756_s19 + $0xc8] sm:$0xff]  ;;  %v306_v50 = vld [vmem:[%s2756_s19 + $0xd0] sm:$0xff]  ;;  %v307_v55 = vld [vmem:[%s2756_s19 + $0xd8] sm:$0xff] }
  0x1f   : > { %2305 = vmatmul.msk.f32.gmra.mxu0 %vm317_vm1, %v281_v2  ;;  %2329 = vmatmul.msk.f32.vlgmr.msra.gmra.mxu3 %vm317_vm1, %v305_v45  ;;  %v304_v58 = vld [vmem:[%s2756_s19 + $0xc0] sm:$0xff]  ;;  %v309_v0 = vld [vmem:[%s2756_s19 + $0xe8] sm:$0xff]  ;;  %v815_v13 = vld [vmem:[%s3636_s5 + $0x10] sm:$0xff] }
  0x20   : > { %v308_v60 = vld [vmem:[%s2756_s19 + $0xe0] sm:$0xff] }
  0x21   : > { %v813_v16 = vld [vmem:[%s3636_s5] sm:$0xff] }
  0x27   : > { %2306 = vmatmul.msk.f32.gmra.mxu0 %vm317_vm1, %v282_v3  ;;  %2330 = vmatmul.msk.f32.gmra.mxu3 %vm317_vm1, %v306_v50 }
  0x2f   : > { %2307 = vmatmul.msk.f32.gmra.mxu0 %vm317_vm1, %v283_v4  ;;  %2331 = vmatmul.msk.f32.gmra.mxu3 %vm317_vm1, %v307_v55  ;;  %v310_v4 = vld [vmem:[%s2756_s19 + $0xf0] sm:$0xff] }
  0x37   : > { %2308 = vmatmul.msk.f32.gmra.mxu0 %vm317_vm1, %v284_v5  ;;  %2332 = vmatmul.msk.f32.gmra.mxu3 %vm317_vm1, %v308_v60 }
  0x3f   : > { %2309 = vmatmul.msk.f32.gmra.mxu0 %vm317_vm1, %v285_v6  ;;  %2333 = vmatmul.msk.f32.gmra.mxu3 %vm317_vm1, %v309_v0 }
  0x47   : > { %2310 = vmatmul.msk.f32.gmra.mxu0 %vm317_vm1, %v286_v7  ;;  %2334 = vmatmul.msk.f32.gmra.mxu3 %vm317_vm1, %v310_v4 }
  0x4f   : > { %2311 = vmatmul.msk.f32.gmra.mxu0 %vm317_vm1, %v287_v8  ;;  %v311_v8 = vld [vmem:[%s2756_s19 + $0xf8] sm:$0xff]  ;;  %s2405_s19 = sshll.u32 %s2722_s28, 8  ;;  %s2219_s28 = scalar_lea.sflag [#allocation3], %s270_s15 }
  0x50   : > { %2335 = vmatmul.msk.f32.gmra.mxu3 %vm317_vm1, %v311_v8  ;;  %s2230_s23 = scalar_lea.hbm %s3638_s7, %s2405_s19 }
  0x51   : > { %s2233_s8 = sshll.u32 %s2230_s23, 4  ;;  %s2234_s8 = int_to_ptr.hbm [resolvable:$true] %s2233_s8 }
  0x52   : > { %s2607_s9 = sshra.s32 %s2234_s8, 4  ;;  %s2608_s9 = int_to_ptr.hbm [resolvable:$true] %s2607_s9 }
  0x53   : > { %s2609_s13 = scalar_lea.hbm %s2608_s9, 256  ;;  %p2614_p0 = scmp.lt.s32.totalorder %s2608_s9, %s3638_s7 }
  0x54   : > { %p2610_p11 = scmp.ne.s32.totalorder %s2608_s9, %s2609_s13  ;;  %p2615_p1 = scmp.lt.s32.totalorder %s2613_s18, %s2609_s13 }
  0x56   : > { %p2611_p12 = pnand %p2610_p11, %p2739_p5  ;;  %p2616_p2 = por %p2615_p1, %p2614_p0 }
  0x57   : > { %2312 = vmatmul.msk.f32.gmra.mxu0 %vm317_vm1, %v288_v9 }
  0x58   : > { %p2612_p13 = pneg %p2611_p12 }
  0x5a   : > { %p2617_p3 = pnand %p2616_p2, %p2612_p13 }
  0x5f   : > { %2313 = vmatmul.msk.f32.gmra.mxu0 %vm317_vm1, %v289_v10  ;;  %v816_v10 = vld [vmem:[%s3636_s5 + $0x18] sm:$0xff] }
  0x60   : > { %929 = vmatpush.msra.mxu2 %v816_v10  ;;  %2411 = vmatpush.msra.mxu3 %v816_v10 }
  0x62   : > { %930 = vmatpush.msra.mxu2 %v815_v13  ;;  %2412 = vmatpush.msra.mxu3 %v815_v13 }
  0x67   : > { %2314 = vmatmul.msk.f32.gmra.mxu0 %vm317_vm1, %v290_v11 }
  0x6f   : > { %2315 = vmatmul.msk.f32.gmra.mxu0 %vm317_vm1, %v291_v12 }
  0x77   : > { %2316 = vmatmul.msk.f32.gmra.mxu0 %vm317_vm1, %v292_v15  ;;  %v814_v15 = vld [vmem:[%s3636_s5 + $0x8] sm:$0xff] }
  0x78   : > { %931 = vmatpush.msra.mxu2 %v814_v15  ;;  %2413 = vmatpush.msra.mxu3 %v814_v15 }
  0x7a   : > { %932 = vmatpush.msra.mxu2 %v813_v16  ;;  %2414 = vmatpush.msra.mxu3 %v813_v16 }
  0x7f   : > { %2317 = vmatmul.msk.f32.gmra.mxu0 %vm317_vm1, %v293_v18 }
  0x87   : > { %2318 = vmatmul.msk.f32.gmra.mxu0 %vm317_vm1, %v294_v19 }
  0x8f   : > { %2319 = vmatmul.msk.f32.gmra.mxu0 %vm317_vm1, %v295_v20 }
  0x94   : > { %v435_v22 = vpop.f32.mrf.mxu0 }
  0x95   : > { %v436_v24 = vadd.f32 %v2805_v21, %v435_v22 }
  0x97   : > { %v531_v25 = vmax.f32 %v436_v24, 0.0  ;;  %2320 = vmatmul.msk.f32.gmra.mxu0 %vm317_vm1, %v296_v23 }
  0x99   : > { %2336 = vmatmul.msk.f32.vlgmr.msra.gmra.mxu1 %vm571_vm2, %v531_v25 }
  0x9c   : > { %v438_v26 = vpop.f32.mrf.mxu0 }
  0x9d   : > { %v439_v28 = vadd.f32 %v2805_v21, %v438_v26 }
  0x9f   : > { %v532_v29 = vmax.f32 %v439_v28, 0.0  ;;  %2321 = vmatmul.msk.f32.gmra.mxu0 %vm317_vm1, %v297_v27  ;;  %v2886_v27 = vld [vmem:[%s3635_s4] ss:$0 sm:$0xff] }
  0xa1   : > { %2337 = vmatmul.msk.f32.gmra.mxu1 %vm571_vm2, %v532_v29 }
  0xa4   : > { %v441_v30 = vpop.f32.mrf.mxu0 }
  0xa5   : > { %v442_v32 = vadd.f32 %v2805_v21, %v441_v30 }
  0xa7   : > { %v533_v33 = vmax.f32 %v442_v32, 0.0  ;;  %2322 = vmatmul.msk.f32.gmra.mxu0 %vm317_vm1, %v298_v31 }
  0xa9   : > { %2338 = vmatmul.msk.f32.gmra.mxu1 %vm571_vm2, %v533_v33 }
  0xac   : > { %v444_v34 = vpop.f32.mrf.mxu0 }
  0xad   : > { %v445_v36 = vadd.f32 %v2805_v21, %v444_v34 }
  0xaf   : > { %v534_v37 = vmax.f32 %v445_v36, 0.0  ;;  %2323 = vmatmul.msk.f32.gmra.mxu0 %vm317_vm1, %v299_v35 }
  0xb1   : > { %2339 = vmatmul.msk.f32.gmra.mxu1 %vm571_vm2, %v534_v37 }
  0xb4   : > { %v447_v38 = vpop.f32.mrf.mxu0 }
  0xb5   : > { %v448_v40 = vadd.f32 %v2805_v21, %v447_v38 }
  0xb7   : > { %v535_v41 = vmax.f32 %v448_v40, 0.0  ;;  %2324 = vmatmul.msk.f32.gmra.mxu0 %vm317_vm1, %v300_v39 }
  0xb9   : > { %2340 = vmatmul.msk.f32.gmra.mxu1 %vm571_vm2, %v535_v41 }
  0xbc   : > { %v450_v42 = vpop.f32.mrf.mxu0 }
  0xbd   : > { %v451_v44 = vadd.f32 %v2805_v21, %v450_v42 }
  0xbf   : > { %v536_v46 = vmax.f32 %v451_v44, 0.0  ;;  %2325 = vmatmul.msk.f32.gmra.mxu0 %vm317_vm1, %v301_v43 }
  0xc1   : > { %2341 = vmatmul.msk.f32.gmra.mxu1 %vm571_vm2, %v536_v46 }
  0xc4   : > { %v453_v47 = vpop.f32.mrf.mxu0 }
  0xc5   : > { %v454_v49 = vadd.f32 %v2805_v21, %v453_v47 }
  0xc7   : > { %v537_v51 = vmax.f32 %v454_v49, 0.0  ;;  %2326 = vmatmul.msk.f32.gmra.mxu0 %vm317_vm1, %v302_v48 }
  0xc9   : > { %2342 = vmatmul.msk.f32.gmra.mxu1 %vm571_vm2, %v537_v51 }
  0xcc   : > { %v456_v52 = vpop.f32.mrf.mxu0 }
  0xcd   : > { %v457_v54 = vadd.f32 %v2805_v21, %v456_v52 }
  0xcf   : > { %v538_v56 = vmax.f32 %v457_v54, 0.0  ;;  %2327 = vmatmul.msk.f32.gmra.mxu0 %vm317_vm1, %v303_v53 }
  0xd1   : > { %2343 = vmatmul.msk.f32.gmra.mxu1 %vm571_vm2, %v538_v56 }
  0xd4   : > { %v459_v57 = vpop.f32.mrf.mxu0 }
  0xd5   : > { %v460_v59 = vadd.f32 %v2805_v21, %v459_v57 }
  0xd7   : > { %v539_v61 = vmax.f32 %v460_v59, 0.0  ;;  %2328 = vmatmul.msk.f32.gmra.mxu0 %vm317_vm1, %v304_v58 }
  0xd9   : > { %2344 = vmatmul.msk.f32.gmra.mxu1 %vm571_vm2, %v539_v61 }
  0xdc   : > { %v462_v62 = vpop.f32.mrf.mxu0 }
  0xdd   : > { %v463_v63 = vadd.f32 %v2805_v21, %v462_v62 }
  0xdf   : > { %v540_v1 = vmax.f32 %v463_v63, 0.0 }
  0xe1   : > { %2345 = vmatmul.msk.f32.gmra.mxu1 %vm571_vm2, %v540_v1 }
  0xe4   : > { %v465_v2 = vpop.f32.mrf.mxu0 }
  0xe5   : > { %v466_v3 = vadd.f32 %v2805_v21, %v465_v2 }
  0xe7   : > { %v541_v5 = vmax.f32 %v466_v3, 0.0 }
  0xe9   : > { %2346 = vmatmul.msk.f32.gmra.mxu1 %vm571_vm2, %v541_v5 }
  0xec   : > { %v468_v6 = vpop.f32.mrf.mxu0 }
  0xed   : > { %v469_v7 = vadd.f32 %v2805_v21, %v468_v6  ;;  %v510_v6 = vpop.f32.mrf.mxu3 }
  0xef   : > { %v542_v9 = vmax.f32 %v469_v7, 0.0 }
  0xf1   : > { %2347 = vmatmul.msk.f32.gmra.mxu1 %vm571_vm2, %v542_v9 }
  0xf4   : > { %v471_v11 = vpop.f32.mrf.mxu0 }
  0xf5   : > { %v472_v12 = vadd.f32 %v2805_v21, %v471_v11 }
  0xf7   : > { %v543_v14 = vmax.f32 %v472_v12, 0.0 }
  0xf9   : > { %2348 = vmatmul.msk.f32.gmra.mxu1 %vm571_vm2, %v543_v14  ;;  %v513_v14 = vpop.f32.mrf.mxu3 }
  0xfc   : > { %v474_v17 = vpop.f32.mrf.mxu0 }
  0xfd   : > { %v475_v18 = vadd.f32 %v2805_v21, %v474_v17 }
  0xff   : > { %v544_v19 = vmax.f32 %v475_v18, 0.0 }
 0x101   : > { %2349 = vmatmul.msk.f32.gmra.mxu1 %vm571_vm2, %v544_v19 }
 0x104   : > { %v477_v20 = vpop.f32.mrf.mxu0 }
 0x105   : > { %v478_v22 = vadd.f32 %v2805_v21, %v477_v20  ;;  %v511_v20 = vadd.f32 %v2805_v21, %v510_v6 }
 0x107   : > { %v545_v23 = vmax.f32 %v478_v22, 0.0  ;;  %v556_v22 = vmax.f32 %v511_v20, 0.0 }
 0x109   : > { %2350 = vmatmul.msk.f32.gmra.mxu1 %vm571_vm2, %v545_v23 }
 0x10c   : > { %v480_v24 = vpop.f32.mrf.mxu0 }
 0x10d   : > { %v481_v25 = vadd.f32 %v2805_v21, %v480_v24  ;;  %v516_v24 = vpop.f32.mrf.mxu3 }
 0x10f   : > { %v546_v26 = vmax.f32 %v481_v25, 0.0 }
 0x111   : > { %2351 = vmatmul.msk.f32.gmra.mxu1 %vm571_vm2, %v546_v26 }
 0x114   : > { %v483_v28 = vpop.f32.mrf.mxu0 }
 0x115   : > { %v484_v29 = vadd.f32 %v2805_v21, %v483_v28  ;;  %v514_v28 = vadd.f32 %v2805_v21, %v513_v14 }
 0x116   : > { %v685_v30 = vpop.f32.mrf.mxu1 }
 0x117   : > { %v547_v31 = vmax.f32 %v484_v29, 0.0  ;;  %v686_v32 = vadd.f32 %v2886_v27, %v685_v30  ;;  %v557_v29 = vmax.f32 %v514_v28, 0.0 }
 0x119   : > { %v781_v33 = vmax.f32 %v686_v32, 0.0  ;;  %2352 = vmatmul.msk.f32.gmra.mxu1 %vm571_vm2, %v547_v31  ;;  %v519_v32 = vpop.f32.mrf.mxu3 }
 0x11b   : > { %2368 = vmatmul.msk.f32.vlgmr.msra.gmra.mxu2 %vm571_vm2, %v781_v33 }
 0x11c   : > { %v486_v34 = vpop.f32.mrf.mxu0 }
 0x11d   : > { %v487_v35 = vadd.f32 %v2805_v21, %v486_v34  ;;  %v517_v34 = vadd.f32 %v2805_v21, %v516_v24 }
 0x11e   : > { %v688_v36 = vpop.f32.mrf.mxu1 }
 0x11f   : > { %v548_v37 = vmax.f32 %v487_v35, 0.0  ;;  %v689_v38 = vadd.f32 %v2886_v27, %v688_v36  ;;  %v558_v35 = vmax.f32 %v517_v34, 0.0 }
 0x121   : > { %v782_v39 = vmax.f32 %v689_v38, 0.0  ;;  %2353 = vmatmul.msk.f32.gmra.mxu1 %vm571_vm2, %v548_v37 }
 0x123   : > { %2369 = vmatmul.msk.f32.gmra.mxu2 %vm571_vm2, %v782_v39  ;;  %v520_v39 = vadd.f32 %v2805_v21, %v519_v32 }
 0x124   : > { %v489_v40 = vpop.f32.mrf.mxu0 }
 0x125   : > { %v490_v41 = vadd.f32 %v2805_v21, %v489_v40  ;;  %v522_v40 = vpop.f32.mrf.mxu3 }
 0x126   : > { %v691_v42 = vpop.f32.mrf.mxu1 }
 0x127   : > { %v549_v43 = vmax.f32 %v490_v41, 0.0  ;;  %v692_v44 = vadd.f32 %v2886_v27, %v691_v42  ;;  %v559_v41 = vmax.f32 %v520_v39, 0.0 }
 0x129   : > { %v783_v45 = vmax.f32 %v692_v44, 0.0  ;;  %2354 = vmatmul.msk.f32.gmra.mxu1 %vm571_vm2, %v549_v43 }
 0x12b   : > { %2370 = vmatmul.msk.f32.gmra.mxu2 %vm571_vm2, %v783_v45  ;;  %v523_v45 = vadd.f32 %v2805_v21, %v522_v40 }
 0x12c   : > { %v492_v46 = vpop.f32.mrf.mxu0 }
 0x12d   : > { %v493_v47 = vadd.f32 %v2805_v21, %v492_v46  ;;  %v525_v46 = vpop.f32.mrf.mxu3 }
 0x12e   : > { %v694_v48 = vpop.f32.mrf.mxu1 }
 0x12f   : > { %v550_v49 = vmax.f32 %v493_v47, 0.0  ;;  %v695_v50 = vadd.f32 %v2886_v27, %v694_v48  ;;  %v560_v47 = vmax.f32 %v523_v45, 0.0 }
 0x131   : > { %v784_v51 = vmax.f32 %v695_v50, 0.0  ;;  %2355 = vmatmul.msk.f32.gmra.mxu1 %vm571_vm2, %v550_v49 }
 0x133   : > { %2371 = vmatmul.msk.f32.gmra.mxu2 %vm571_vm2, %v784_v51  ;;  %v526_v51 = vadd.f32 %v2805_v21, %v525_v46 }
 0x134   : > { %v495_v52 = vpop.f32.mrf.mxu0 }
 0x135   : > { %v496_v53 = vadd.f32 %v2805_v21, %v495_v52  ;;  %v561_v52 = vmax.f32 %v526_v51, 0.0 }
 0x136   : > { %v697_v54 = vpop.f32.mrf.mxu1 }
 0x137   : > { %v698_v55 = vadd.f32 %v2886_v27, %v697_v54  ;;  %v551_v56 = vmax.f32 %v496_v53, 0.0  ;;  %v528_v54 = vpop.f32.mrf.mxu3 }
 0x139   : > { %v785_v57 = vmax.f32 %v698_v55, 0.0  ;;  %2356 = vmatmul.msk.f32.gmra.mxu1 %vm571_vm2, %v551_v56 }
 0x13b   : > { %2372 = vmatmul.msk.f32.gmra.mxu2 %vm571_vm2, %v785_v57  ;;  %v529_v57 = vadd.f32 %v2805_v21, %v528_v54 }
 0x13c   : > { %v498_v58 = vpop.f32.mrf.mxu0 }
 0x13d   : > { %v499_v59 = vadd.f32 %v2805_v21, %v498_v58  ;;  %v562_v58 = vmax.f32 %v529_v57, 0.0 }
 0x13e   : > { %v700_v60 = vpop.f32.mrf.mxu1 }
 0x13f   : > { %v701_v61 = vadd.f32 %v2886_v27, %v700_v60  ;;  %v552_v62 = vmax.f32 %v499_v59, 0.0 }
 0x141   : > { %v786_v63 = vmax.f32 %v701_v61, 0.0  ;;  %2357 = vmatmul.msk.f32.gmra.mxu1 %vm571_vm2, %v552_v62 }
 0x143   : > { %2373 = vmatmul.msk.f32.gmra.mxu2 %vm571_vm2, %v786_v63 }
 0x144   : > { %v501_v0 = vpop.f32.mrf.mxu0 }
 0x145   : > { %v502_v1 = vadd.f32 %v2805_v21, %v501_v0 }
 0x146   : > { %v703_v2 = vpop.f32.mrf.mxu1 }
 0x147   : > { %v704_v3 = vadd.f32 %v2886_v27, %v703_v2  ;;  %v553_v4 = vmax.f32 %v502_v1, 0.0 }
 0x149   : > { %v787_v5 = vmax.f32 %v704_v3, 0.0  ;;  %2358 = vmatmul.msk.f32.gmra.mxu1 %vm571_vm2, %v553_v4 }
 0x14b   : > { %2374 = vmatmul.msk.f32.gmra.mxu2 %vm571_vm2, %v787_v5 }
 0x14c   : > { %v504_v7 = vpop.f32.mrf.mxu0 }
 0x14d   : > { %v505_v8 = vadd.f32 %v2805_v21, %v504_v7 }
 0x14e   : > { %v706_v9 = vpop.f32.mrf.mxu1 }
 0x14f   : > { %v707_v10 = vadd.f32 %v2886_v27, %v706_v9  ;;  %v554_v11 = vmax.f32 %v505_v8, 0.0 }
 0x151   : > { %v788_v12 = vmax.f32 %v707_v10, 0.0  ;;  %2359 = vmatmul.msk.f32.gmra.mxu1 %vm571_vm2, %v554_v11 }
 0x153   : > { %2375 = vmatmul.msk.f32.gmra.mxu2 %vm571_vm2, %v788_v12 }
 0x154   : > { %v507_v13 = vpop.f32.mrf.mxu0 }
 0x155   : > { %v508_v15 = vadd.f32 %v2805_v21, %v507_v13  ;;  %v2957_v21 = vld [vmem:[%s3637_s6] ss:$0 sm:$0xff] }
 0x156   : > { %v709_v16 = vpop.f32.mrf.mxu1 }
 0x157   : > { %v710_v17 = vadd.f32 %v2886_v27, %v709_v16  ;;  %v555_v18 = vmax.f32 %v508_v15, 0.0 }
 0x159   : > { %v789_v19 = vmax.f32 %v710_v17, 0.0  ;;  %2360 = vmatmul.msk.f32.vlgmr.msrb.gmra.mxu3 %vm571_vm2, %v555_v18 }
 0x15b   : > { %2376 = vmatmul.msk.f32.gmra.mxu2 %vm571_vm2, %v789_v19 }
 0x15e   : > { %v712_v23 = vpop.f32.mrf.mxu1 }
 0x15f   : > { %v713_v25 = vadd.f32 %v2886_v27, %v712_v23 }
 0x161   : > { %v790_v26 = vmax.f32 %v713_v25, 0.0  ;;  %2361 = vmatmul.msk.f32.gmra.mxu3 %vm571_vm2, %v556_v22 }
 0x163   : > { %2377 = vmatmul.msk.f32.gmra.mxu2 %vm571_vm2, %v790_v26 }
 0x166   : > { %v715_v30 = vpop.f32.mrf.mxu1 }
 0x167   : > { %v716_v31 = vadd.f32 %v2886_v27, %v715_v30 }
 0x169   : > { %v791_v33 = vmax.f32 %v716_v31, 0.0  ;;  %2362 = vmatmul.msk.f32.gmra.mxu3 %vm571_vm2, %v557_v29 }
 0x16b   : > { %2378 = vmatmul.msk.f32.gmra.mxu2 %vm571_vm2, %v791_v33 }
 0x16e   : > { %v718_v36 = vpop.f32.mrf.mxu1 }
 0x16f   : > { %v719_v37 = vadd.f32 %v2886_v27, %v718_v36 }
 0x171   : > { %v792_v38 = vmax.f32 %v719_v37, 0.0  ;;  %2363 = vmatmul.msk.f32.gmra.mxu3 %vm571_vm2, %v558_v35 }
 0x173   : > { %2379 = vmatmul.msk.f32.gmra.mxu2 %vm571_vm2, %v792_v38 }
 0x176   : > { %v721_v42 = vpop.f32.mrf.mxu1 }
 0x177   : > { %v722_v43 = vadd.f32 %v2886_v27, %v721_v42 }
 0x179   : > { %v793_v44 = vmax.f32 %v722_v43, 0.0  ;;  %2364 = vmatmul.msk.f32.gmra.mxu3 %vm571_vm2, %v559_v41 }
 0x17b   : > { %2380 = vmatmul.msk.f32.gmra.mxu2 %vm571_vm2, %v793_v44 }
 0x17e   : > { %v724_v48 = vpop.f32.mrf.mxu1 }
 0x17f   : > { %v725_v49 = vadd.f32 %v2886_v27, %v724_v48 }
 0x181   : > { %v794_v50 = vmax.f32 %v725_v49, 0.0  ;;  %2365 = vmatmul.msk.f32.gmra.mxu3 %vm571_vm2, %v560_v47 }
 0x183   : > { %2381 = vmatmul.msk.f32.gmra.mxu2 %vm571_vm2, %v794_v50 }
 0x186   : > { %v727_v53 = vpop.f32.mrf.mxu1 }
 0x187   : > { %v728_v55 = vadd.f32 %v2886_v27, %v727_v53 }
 0x189   : > { %v795_v56 = vmax.f32 %v728_v55, 0.0  ;;  %2366 = vmatmul.msk.f32.gmra.mxu3 %vm571_vm2, %v561_v52 }
 0x18b   : > { %2382 = vmatmul.msk.f32.gmra.mxu2 %vm571_vm2, %v795_v56 }
 0x18e   : > { %v730_v59 = vpop.f32.mrf.mxu1 }
 0x18f   : > { %v731_v60 = vadd.f32 %v2886_v27, %v730_v59 }
 0x191   : > { %v796_v61 = vmax.f32 %v731_v60, 0.0  ;;  %2367 = vmatmul.msk.f32.gmra.mxu3 %vm571_vm2, %v562_v58 }
 0x193   : > { %2383 = vmatmul.msk.f32.gmra.mxu2 %vm571_vm2, %v796_v61 }
 0x196   : > { %v733_v62 = vpop.f32.mrf.mxu1 }
 0x197   : > { %v734_v63 = vadd.f32 %v2886_v27, %v733_v62 }
 0x199   : > { %v797_v0 = vmax.f32 %v734_v63, 0.0 }
 0x19b   : > { %2384 = vmatmul.msk.f32.gmra.mxu2 %vm571_vm2, %v797_v0 }
 0x19e   : > { %v736_v1 = vpop.f32.mrf.mxu1  ;;  %v934_v2 = vpop.f32.mrf.mxu2 }
 0x19f   : > { %v737_v3 = vadd.f32 %v2886_v27, %v736_v1  ;;  %v2961_v4 = vadd.f32 %v2957_v21, %v934_v2 }
 0x1a1   : > { %v798_v5 = vmax.f32 %v737_v3, 0.0  ;;  %1062 = vrot.lane.b32.xlu0 %v2961_v4, %s2657_s14 }
 0x1a3   : > { %2385 = vmatmul.msk.f32.gmra.mxu2 %vm571_vm2, %v798_v5 }
 0x1a6   : > { %v739_v6 = vpop.f32.mrf.mxu1  ;;  %v937_v7 = vpop.f32.mrf.mxu2 }
 0x1a7   : > { %v740_v8 = vadd.f32 %v2886_v27, %v739_v6  ;;  %v2968_v9 = vadd.f32 %v2957_v21, %v937_v7 }
 0x1a9   : > { %v799_v10 = vmax.f32 %v740_v8, 0.0  ;;  %1064 = vrot.lane.b32.xlu0 %v2968_v9, %s2657_s14 }
 0x1ab   : > { %2386 = vmatmul.msk.f32.gmra.mxu2 %vm571_vm2, %v799_v10 }
 0x1ae   : > { %v742_v11 = vpop.f32.mrf.mxu1  ;;  %v940_v12 = vpop.f32.mrf.mxu2 }
 0x1af   : > { %v743_v13 = vadd.f32 %v2886_v27, %v742_v11  ;;  %v2975_v14 = vadd.f32 %v2957_v21, %v940_v12 }
 0x1b1   : > { %v800_v15 = vmax.f32 %v743_v13, 0.0  ;;  %1066 = vrot.lane.b32.xlu1 %v2975_v14, %s2657_s14 }
 0x1b3   : > { %2387 = vmatmul.msk.f32.gmra.mxu2 %vm571_vm2, %v800_v15 }
 0x1b6   : > { %v943_v16 = vpop.f32.mrf.mxu2  ;;  %v745_v17 = vpop.f32.mrf.mxu1 }
 0x1b7   : > { %v2981_v18 = vadd.f32 %v2957_v21, %v943_v16  ;;  %v746_v19 = vadd.f32 %v2886_v27, %v745_v17 }
 0x1b9   : > { %v801_v20 = vmax.f32 %v746_v19, 0.0  ;;  %1068 = vrot.lane.b32.xlu1 %v2981_v18, %s2657_s14  ;;  %v2658_v19 = vmov 1  }
 0x1ba   : > { %2458 = vset.pattern.permute.xlu2 %v2658_v19  ;;  %2459 = vset.pattern.permute.xlu0 %v2658_v19 }
 0x1bb   : > { %2388 = vmatmul.msk.f32.gmra.mxu2 %vm571_vm2, %v801_v20  ;;  %2460 = vset.pattern.permute.xlu1 %v2658_v19 }
 0x1be   : > { %v946_v22 = vpop.f32.mrf.mxu2  ;;  %v748_v23 = vpop.f32.mrf.mxu1 }
 0x1bf   : > { %v2988_v24 = vadd.f32 %v2957_v21, %v946_v22  ;;  %v749_v25 = vadd.f32 %v2886_v27, %v748_v23 }
 0x1c1   : > { %v802_v26 = vmax.f32 %v749_v25, 0.0  ;;  %1070 = vrot.lane.b32.xlu2 %v2988_v24, %s2657_s14 }
 0x1c3   : > { %2389 = vmatmul.msk.f32.gmra.mxu2 %vm571_vm2, %v802_v26 }
 0x1c6   : > { %v949_v28 = vpop.f32.mrf.mxu2  ;;  %v751_v29 = vpop.f32.mrf.mxu1 }
 0x1c7   : > { %v2995_v30 = vadd.f32 %v2957_v21, %v949_v28  ;;  %v752_v31 = vadd.f32 %v2886_v27, %v751_v29 }
 0x1c9   : > { %v803_v32 = vmax.f32 %v752_v31, 0.0  ;;  %1072 = vrot.lane.b32.xlu2 %v2995_v30, %s2657_s14 }
 0x1cb   : > { %2390 = vmatmul.msk.f32.gmra.mxu2 %vm571_vm2, %v803_v32 }
 0x1ce   : > { %v952_v33 = vpop.f32.mrf.mxu2  ;;  %v754_v34 = vpop.f32.mrf.mxu1 }
 0x1cf   : > { %v3002_v35 = vadd.f32 %v2957_v21, %v952_v33  ;;  %v755_v36 = vadd.f32 %v2886_v27, %v754_v34 }
 0x1d1   : > { %v804_v37 = vmax.f32 %v755_v36, 0.0  ;;  %1074 = vrot.lane.b32.xlu0 %v3002_v35, %s2657_s14 }
 0x1d3   : > { %2391 = vmatmul.msk.f32.gmra.mxu2 %vm571_vm2, %v804_v37 }
 0x1d6   : > { %v955_v38 = vpop.f32.mrf.mxu2 }
 0x1d7   : > { %v3009_v39 = vadd.f32 %v2957_v21, %v955_v38 }
 0x1d9   : > { %1076 = vrot.lane.b32.xlu1 %v3009_v39, %s2657_s14 }
 0x1dc   : > { %v757_v40 = vpop.f32.mrf.mxu3 }
 0x1dd   : > { %v758_v41 = vadd.f32 %v2886_v27, %v757_v40 }
 0x1de   : > { %v958_v42 = vpop.f32.mrf.mxu2 }
 0x1df   : > { %v3015_v43 = vadd.f32 %v2957_v21, %v958_v42  ;;  %v805_v44 = vmax.f32 %v758_v41, 0.0 }
 0x1e1   : > { %1078 = vrot.lane.b32.xlu2 %v3015_v43, %s2657_s14  ;;  %2392 = vmatmul.msk.f32.vlgmr.msra.gmra.mxu3 %vm571_vm2, %v805_v44 }
 0x1e4   : > { %v760_v45 = vpop.f32.mrf.mxu3 }
 0x1e5   : > { %v761_v46 = vadd.f32 %v2886_v27, %v760_v45 }
 0x1e6   : > { %v961_v47 = vpop.f32.mrf.mxu2 }
 0x1e7   : > { %v3022_v48 = vadd.f32 %v2957_v21, %v961_v47  ;;  %v806_v49 = vmax.f32 %v761_v46, 0.0 }
 0x1e9   : > { %1080 = vrot.lane.b32.xlu0 %v3022_v48, %s2657_s14  ;;  %2393 = vmatmul.msk.f32.gmra.mxu3 %vm571_vm2, %v806_v49 }
 0x1ec   : > { %v763_v50 = vpop.f32.mrf.mxu3 }
 0x1ed   : > { %v764_v51 = vadd.f32 %v2886_v27, %v763_v50 }
 0x1ee   : > { %v964_v52 = vpop.f32.mrf.mxu2 }
 0x1ef   : > { %v3029_v53 = vadd.f32 %v2957_v21, %v964_v52  ;;  %v807_v54 = vmax.f32 %v764_v51, 0.0 }
 0x1f1   : > { %1082 = vrot.lane.b32.xlu1 %v3029_v53, %s2657_s14  ;;  %2394 = vmatmul.msk.f32.gmra.mxu3 %vm571_vm2, %v807_v54 }
 0x1f4   : > { %v766_v55 = vpop.f32.mrf.mxu3 }
 0x1f5   : > { %v767_v56 = vadd.f32 %v2886_v27, %v766_v55 }
 0x1f6   : > { %v967_v57 = vpop.f32.mrf.mxu2 }
 0x1f7   : > { %v3036_v58 = vadd.f32 %v2957_v21, %v967_v57  ;;  %v808_v59 = vmax.f32 %v767_v56, 0.0 }
 0x1f9   : > { %1084 = vrot.lane.b32.xlu2 %v3036_v58, %s2657_s14  ;;  %2395 = vmatmul.msk.f32.gmra.mxu3 %vm571_vm2, %v808_v59 }
 0x1fc   : > { %v769_v60 = vpop.f32.mrf.mxu3 }
 0x1fd   : > { %v770_v61 = vadd.f32 %v2886_v27, %v769_v60 }
 0x1fe   : > { %v970_v62 = vpop.f32.mrf.mxu2 }
 0x1ff   : > { %v3043_v63 = vadd.f32 %v2957_v21, %v970_v62  ;;  %v809_v0 = vmax.f32 %v770_v61, 0.0 }
 0x201   : > { %1086 = vrot.lane.b32.xlu0 %v3043_v63, %s2657_s14  ;;  %2396 = vmatmul.msk.f32.gmra.mxu3 %vm571_vm2, %v809_v0 }
 0x204   : > { %v772_v1 = vpop.f32.mrf.mxu3 }
 0x205   : > { %v773_v2 = vadd.f32 %v2886_v27, %v772_v1 }
 0x206   : > { %v973_v3 = vpop.f32.mrf.mxu2 }
 0x207   : > { %v3050_v5 = vadd.f32 %v2957_v21, %v973_v3  ;;  %v810_v6 = vmax.f32 %v773_v2, 0.0 }
 0x209   : > { %1088 = vrot.lane.b32.xlu1 %v3050_v5, %s2657_s14  ;;  %2397 = vmatmul.msk.f32.gmra.mxu3 %vm571_vm2, %v810_v6 }
 0x20c   : > { %v775_v7 = vpop.f32.mrf.mxu3 }
 0x20d   : > { %v776_v8 = vadd.f32 %v2886_v27, %v775_v7 }
 0x20e   : > { %v976_v10 = vpop.f32.mrf.mxu2 }
 0x20f   : > { %v3057_v11 = vadd.f32 %v2957_v21, %v976_v10  ;;  %v811_v12 = vmax.f32 %v776_v8, 0.0 }
 0x211   : > { %1090 = vrot.lane.b32.xlu2 %v3057_v11, %s2657_s14  ;;  %2398 = vmatmul.msk.f32.gmra.mxu3 %vm571_vm2, %v811_v12 }
 0x213   : > { %v1063_v13 = vpop.permute.xlu0 %1062 }
 0x214   : > { %v1158_v15 = vsub.f32 %v2961_v4, %v1063_v13  ;;  %v778_v16 = vpop.f32.mrf.mxu3 }
 0x215   : > { %v779_v17 = vadd.f32 %v2886_v27, %v778_v16 }
 0x216   : > { %v1190_v20 = vsub.f32 0.0, %v1158_v15  ;;  %v979_v22 = vpop.f32.mrf.mxu2 }
 0x217   : > { %v3065_v23 = vadd.f32 %v2957_v21, %v979_v22  ;;  %v812_v25 = vmax.f32 %v779_v17, 0.0 }
 0x218   : > { %v1222_v26 = vmul.f32 1.442695, %v1190_v20 }
 0x219   : > { %1092 = vrot.lane.b32.xlu0 %v3065_v23, %s2657_s14  ;;  %2399 = vmatmul.msk.f32.gmra.mxu3 %vm571_vm2, %v812_v25 }
 0x21a   : > { %2464 = vpow2.f32 %v1222_v26 }
 0x21b   : > { %v1071_v4 = vpop.permute.xlu2 %1070  ;;  %v1065_v28 = vpop.permute.xlu0 %1064 }
 0x21c   : > { %v1162_v27 = vsub.f32 %v2988_v24, %v1071_v4  ;;  %v1159_v29 = vsub.f32 %v2968_v9, %v1065_v28 }
 0x21e   : > { %v1191_v31 = vsub.f32 0.0, %v1159_v29  ;;  %v982_v32 = vpop.f32.mrf.mxu2  ;;  %v1194_v33 = vsub.f32 0.0, %v1162_v27 }
 0x21f   : > { %v3073_v34 = vadd.f32 %v2957_v21, %v982_v32 }
 0x220   : > { %v2465_v36 = vpop.eup %2464  ;;  %v1224_v37 = vmul.f32 1.442695, %v1191_v31  ;;  %v1230_v40 = vmul.f32 1.442695, %v1194_v33 }
 0x221   : > { %v1286_v38 = vadd.f32 1.0, %v2465_v36  ;;  %1094 = vrot.lane.b32.xlu1 %v3073_v34, %s2657_s14 }
 0x223   : > { %2466 = vrcp.f32 %v1286_v38  ;;  %v1067_v41 = vpop.permute.xlu1 %1066  ;;  %v1073_v44 = vpop.permute.xlu2 %1072  ;;  %v1327_v57 = vand.u32 2147483647, %v1286_v38  ;;  %v1329_v59 = vand.u32 2147483648, %v1286_v38  ;;  %vm1323_vm4 = vweird.f32 %v1286_v38 }
 0x224   : > { %2468 = vpow2.f32 %v1224_v37  ;;  %v1160_v24 = vsub.f32 %v2975_v14, %v1067_v41  ;;  %v1163_v50 = vsub.f32 %v2995_v30, %v1073_v44 }
 0x225   : > { %2470 = vpow2.f32 %v1230_v40  ;;  %vm1328_vm6 = vcmp.eq.f32.partialorder %v1327_v57, 8.507059e+37 }
 0x226   : > { %v1192_v42 = vsub.f32 0.0, %v1160_v24  ;;  %v985_v9 = vpop.f32.mrf.mxu2  ;;  %v1195_v60 = vsub.f32 0.0, %v1163_v50 }
 0x227   : > { %v3079_v45 = vadd.f32 %v2957_v21, %v985_v9 }
 0x228   : > { %v1226_v46 = vmul.f32 1.442695, %v1192_v42  ;;  %v1232_v7 = vmul.f32 1.442695, %v1195_v60 }
 0x229   : > { %v2467_v47 = vpop.eup %2466  ;;  %1096 = vrot.lane.b32.xlu2 %v3079_v45, %s2657_s14 }
 0x22a   : > { %v2469_v49 = vpop.eup %2468  ;;  %v1319_v51 = vmul.f32 %v2467_v47, %v1286_v38  ;;  %2472 = vpow2.f32 %v1226_v46  ;;  %vm1324_vm3 = vweird.f32 %v2467_v47 }
 0x22b   : > { %v1287_v52 = vadd.f32 1.0, %v2469_v49  ;;  %v1069_v54 = vpop.permute.xlu1 %1068  ;;  %v2471_v56 = vpop.eup %2470  ;;  %vm1325_vm5 = vmor %vm1323_vm4, %vm1324_vm3 }
 0x22c   : > { %v1161_v14 = vsub.f32 %v2981_v18, %v1069_v54  ;;  %v1320_v55 = vsub.f32 1.0, %v1319_v51  ;;  %v3088_v30 = vadd.f32 1.0, %v2471_v56  ;;  %v1330_v18 = vor.u32 1.1754944e-38, %v1329_v59 }
 0x22d   : > { %2474 = vrcp.f32 %v1287_v52  ;;  %v1343_v20 = vand.u32 2147483648, %v1287_v52  ;;  %v1341_v26 = vand.u32 2147483647, %v1287_v52  ;;  %vm1337_vm8 = vweird.f32 %v1287_v52 }
 0x22e   : > { %v1193_v61 = vsub.f32 0.0, %v1161_v14  ;;  %v988_v62 = vpop.f32.mrf.mxu2  ;;  %v1321_v0 = vmul.f32 %v2467_v47, %v1320_v55  ;;  %vm1379_vm4 = vweird.f32 %v3088_v30 }
 0x22f   : > { %v3086_v1 = vadd.f32 %v2957_v21, %v988_v62  ;;  %v1344_v33 = vor.u32 1.1754944e-38, %v1343_v20  ;;  %vm1342_vm10 = vcmp.eq.f32.partialorder %v1341_v26, 8.507059e+37 }
 0x230   : > { %v1228_v2 = vmul.f32 1.442695, %v1193_v61  ;;  %v1322_v3 = vadd.f32 %v2467_v47, %v1321_v0  ;;  %v2473_v6 = vpop.eup %2472 }
 0x231   : > { %1098 = vrot.lane.b32.xlu0 %v3086_v1, %s2657_s14  ;;  %v1288_v12 = vadd.f32 1.0, %v2473_v6 }
 0x232   : > { %2476 = vpow2.f32 %v1228_v2  ;;  %v1326_v8 = vsel %vm1325_vm5, %v2467_v47, %v1322_v3 }
 0x233   : > { %v2475_v10 = vpop.eup %2474  ;;  %v1331_v13 = vsel %vm1328_vm6, %v1330_v18, %v1326_v8  ;;  %2478 = vrcp.f32 %v3088_v30  ;;  %v1355_v46 = vand.u32 2147483647, %v1288_v12  ;;  %v1357_v47 = vand.u32 2147483648, %v1288_v12 }
 0x234   : > { %1804 = vperm.xlu2 %2458, %v1331_v13   ;;  %v1333_v15 = vmul.f32 %v2475_v10, %v1287_v52  ;;  %2480 = vrcp.f32 %v1288_v12  ;;  %vm1338_vm7 = vweird.f32 %v2475_v10  ;;  %v1766_v27 = vsub.f32 1.0, %v1331_v13 }
 0x235   : > { %2482 = vpow2.f32 %v1232_v7  ;;  %vm1339_vm9 = vmor %vm1337_vm8, %vm1338_vm7  ;;  %vm1351_vm12 = vweird.f32 %v1288_v12  ;;  %vm1356_vm14 = vcmp.eq.f32.partialorder %v1355_v46, 8.507059e+37  ;;  %v1358_v56 = vor.u32 1.1754944e-38, %v1357_v47 }
 0x236   : > { %v991_v16 = vpop.f32.mrf.mxu2  ;;  %v1334_v17 = vsub.f32 1.0, %v1333_v15 }
 0x237   : > { %v3094_v19 = vadd.f32 %v2957_v21, %v991_v16 }
 0x238   : > { %v2477_v22 = vpop.eup %2476  ;;  %v1335_v25 = vmul.f32 %v2475_v10, %v1334_v17 }
 0x239   : > { %v3096_v4 = vadd.f32 1.0, %v2477_v22  ;;  %1100 = vrot.lane.b32.xlu1 %v3094_v19, %s2657_s14  ;;  %v3100_v28 = vpop.eup %2478 }
 0x23a   : > { %v1336_v29 = vadd.f32 %v2475_v10, %v1335_v25  ;;  %v2481_v31 = vpop.eup %2480  ;;  %v1375_v24 = vmul.f32 %v3100_v28, %v3088_v30  ;;  %vm1380_vm2 = vweird.f32 %v3100_v28  ;;  %v1385_v25 = vand.u32 2147483648, %v3088_v30 }
 0x23b   : > { %2484 = vrcp.f32 %v3096_v4  ;;  %v1079_v32 = vpop.permute.xlu2 %1078  ;;  %v2483_v36 = vpop.eup %2482  ;;  %v1347_v38 = vmul.f32 %v2481_v31, %v1288_v12  ;;  %vm1352_vm11 = vweird.f32 %v2481_v31  ;;  %v1371_v2 = vand.u32 2147483648, %v3096_v4  ;;  %vm1381_vm5 = vmor %vm1379_vm4, %vm1380_vm2 }
 0x23c   : > { %1996 = vperm.xlu2 %2458, %v1766_v27   ;;  %v1340_v37 = vsel %vm1339_vm9, %v2475_v10, %v1336_v29  ;;  %v1166_v40 = vsub.f32 %v3015_v43, %v1079_v32  ;;  %v3106_v44 = vadd.f32 1.0, %v2483_v36  ;;  %v1376_v54 = vsub.f32 1.0, %v1375_v24  ;;  %vm1353_vm13 = vmor %vm1351_vm12, %vm1352_vm11 }
 0x23d   : > { %v1345_v41 = vsel %vm1342_vm10, %v1344_v33, %v1340_v37  ;;  %v1348_v9 = vsub.f32 1.0, %v1347_v38  ;;  %v1369_v8 = vand.u32 2147483647, %v3096_v4  ;;  %vm1365_vm0 = vweird.f32 %v3096_v4 }
 0x23e   : > { %1809 = vperm.xlu0 %2459, %v1345_v41   ;;  %v994_v42 = vpop.f32.mrf.mxu2  ;;  %v1198_v52 = vsub.f32 0.0, %v1166_v40  ;;  %2486 = vrcp.f32 %v3106_v44  ;;  %v1767_v57 = vsub.f32 1.0, %v1345_v41  ;;  %v1377_v3 = vmul.f32 %v3100_v28, %v1376_v54 }
 0x23f   : > { %v3109_v49 = vadd.f32 %v2957_v21, %v994_v42  ;;  %v1349_v50 = vmul.f32 %v2481_v31, %v1348_v9  ;;  %v1372_v13 = vor.u32 1.1754944e-38, %v1371_v2  ;;  %vm1370_vm3 = vcmp.eq.f32.partialorder %v1369_v8, 8.507059e+37 }
 0x240   : > { %v1238_v62 = vmul.f32 1.442695, %v1198_v52  ;;  %v1378_v15 = vadd.f32 %v3100_v28, %v1377_v3  ;;  %v1383_v27 = vand.u32 2147483647, %v3088_v30  ;;  %v1386_v37 = vor.u32 1.1754944e-38, %v1385_v25 }
 0x241   : > { %v2485_v51 = vpop.eup %2484  ;;  %v1350_v43 = vadd.f32 %v2481_v31, %v1349_v50  ;;  %vm1393_vm8 = vweird.f32 %v3106_v44 }
 0x242   : > { %v1361_v14 = vmul.f32 %v2485_v51, %v3096_v4  ;;  %vm1366_vm15 = vweird.f32 %v2485_v51  ;;  %2488 = vpow2.f32 %v1238_v62  ;;  %v1382_v33 = vsel %vm1381_vm5, %v3100_v28, %v1378_v15 }
 0x243   : > { %v1075_v55 = vpop.permute.xlu0 %1074  ;;  %v1354_v60 = vsel %vm1353_vm13, %v2481_v31, %v1350_v43  ;;  %vm1367_vm1 = vmor %vm1365_vm0, %vm1366_vm15  ;;  %vm1384_vm6 = vcmp.eq.f32.partialorder %v1383_v27, 8.507059e+37 }
 0x244   : > { %v1164_v59 = vsub.f32 %v3002_v35, %v1075_v55  ;;  %1102 = vrot.lane.b32.xlu2 %v3109_v49, %s2657_s14  ;;  %v1362_v61 = vsub.f32 1.0, %v1361_v14  ;;  %v1359_v0 = vsel %vm1356_vm14, %v1358_v56, %v1354_v60  ;;  %v3120_v12 = vpop.eup %2486  ;;  %v1387_v41 = vsel %vm1384_vm6, %v1386_v37, %v1382_v33 }
 0x245   : > { %1814 = vperm.xlu1 %2460, %v1359_v0   ;;  %v1768_v26 = vsub.f32 1.0, %v1359_v0  ;;  %v1389_v29 = vmul.f32 %v3120_v12, %v3106_v44  ;;  %v1770_v47 = vsub.f32 1.0, %v1387_v41  ;;  %vm1394_vm7 = vweird.f32 %v3120_v12 }
 0x246   : > { %v1196_v18 = vsub.f32 0.0, %v1164_v59  ;;  %2001 = vperm.xlu0 %2459, %v1767_v57   ;;  %v997_v6 = vpop.f32.mrf.mxu2  ;;  %v1363_v7 = vmul.f32 %v2485_v51, %v1362_v61  ;;  %v1399_v59 = vand.u32 2147483648, %v3106_v44  ;;  %vm3161_vm9 = vmor %vm1393_vm8, %vm1394_vm7  ;;  %v1397_v0 = vand.u32 2147483647, %v3106_v44 }
 0x247   : > { %v3125_v16 = vadd.f32 %v2957_v21, %v997_v6  ;;  %v1390_v30 = vsub.f32 1.0, %v1389_v29 }
 0x248   : > { %v1234_v35 = vmul.f32 1.442695, %v1196_v18  ;;  %v1364_v10 = vadd.f32 %v2485_v51, %v1363_v7  ;;  %v2489_v36 = vpop.eup %2488  ;;  %vm1398_vm11 = vcmp.eq.f32.partialorder %v1397_v0, 8.507059e+37 }
 0x249   : > { %v3136_v24 = vadd.f32 1.0, %v2489_v36  ;;  %v1391_v50 = vmul.f32 %v3120_v12, %v1390_v30 }
 0x24a   : > { %2490 = vpow2.f32 %v1234_v35  ;;  %v1368_v17 = vsel %vm1367_vm1, %v2485_v51, %v1364_v10  ;;  %v1400_v35 = vor.u32 1.1754944e-38, %v1399_v59 }
 0x24b   : > { %v1077_v20 = vpop.permute.xlu1 %1076  ;;  %v1373_v22 = vsel %vm1370_vm3, %v1372_v13, %v1368_v17  ;;  %v1392_v56 = vadd.f32 %v3120_v12, %v1391_v50  ;;  %vm1435_vm4 = vweird.f32 %v3136_v24 }
 0x24c   : > { %v1165_v4 = vsub.f32 %v3009_v39, %v1077_v20  ;;  %1819 = vperm.xlu2 %2458, %v1373_v22   ;;  %v1769_v42 = vsub.f32 1.0, %v1373_v22 }
 0x24d   : > { %2006 = vperm.xlu1 %2460, %v1768_v26   ;;  %v1396_v18 = vsel %vm3161_vm9, %v3120_v12, %v1392_v56 }
 0x24e   : > { %v1197_v31 = vsub.f32 0.0, %v1165_v4  ;;  %1104 = vrot.lane.b32.xlu0 %v3125_v16, %s2657_s14  ;;  %v1000_v32 = vpop.f32.mrf.mxu2  ;;  %v1401_v17 = vsel %vm1398_vm11, %v1400_v35, %v1396_v18 }
 0x24f   : > { %v3139_v9 = vadd.f32 %v2957_v21, %v1000_v32  ;;  %v1771_v29 = vsub.f32 1.0, %v1401_v17 }
 0x250   : > { %v2491_v39 = vpop.eup %2490  ;;  %v1236_v38 = vmul.f32 1.442695, %v1197_v31 }
 0x251   : > { %v1292_v40 = vadd.f32 1.0, %v2491_v39 }
 0x252   : > { %2492 = vpow2.f32 %v1236_v38 }
 0x253   : > { %2494 = vrcp.f32 %v1292_v40  ;;  %v1085_v46 = vpop.permute.xlu2 %1084  ;;  %v1413_v6 = vand.u32 2147483648, %v1292_v40  ;;  %vm1407_vm12 = vweird.f32 %v1292_v40 }
 0x254   : > { %2011 = vperm.xlu2 %2458, %v1769_v42   ;;  %v1169_v28 = vsub.f32 %v3036_v58, %v1085_v46  ;;  %2496 = vrcp.f32 %v3136_v24 }
 0x255   : > { %1106 = vrot.lane.b32.xlu1 %v3139_v9, %s2657_s14  ;;  %v1414_v20 = vor.u32 1.1754944e-38, %v1413_v6 }
 0x256   : > { %2016 = vperm.xlu0 %2459, %v1770_v47   ;;  %v1003_v51 = vpop.f32.mrf.mxu2  ;;  %v1201_v55 = vsub.f32 0.0, %v1169_v28 }
 0x257   : > { %v3147_v54 = vadd.f32 %v2957_v21, %v1003_v51 }
 0x258   : > { %v2493_v52 = vpop.eup %2492  ;;  %v1244_v3 = vmul.f32 1.442695, %v1201_v55 }
 0x259   : > { %v2495_v43 = vpop.eup %2494  ;;  %v3149_v14 = vadd.f32 1.0, %v2493_v52 }
 0x25a   : > { %v1403_v58 = vmul.f32 %v2495_v43, %v1292_v40  ;;  %v3156_v60 = vpop.eup %2496  ;;  %vm1408_vm10 = vweird.f32 %v2495_v43 }
 0x25b   : > { %2498 = vrcp.f32 %v3149_v14  ;;  %v1081_v57 = vpop.permute.xlu0 %1080  ;;  %v1431_v10 = vmul.f32 %v3156_v60, %v3136_v24  ;;  %vm1409_vm13 = vmor %vm1407_vm12, %vm1408_vm10  ;;  %v1425_v33 = vand.u32 2147483647, %v3149_v14  ;;  %v1427_v36 = vand.u32 2147483648, %v3149_v14 }
 0x25c   : > { %v1167_v61 = vsub.f32 %v3022_v48, %v1081_v57  ;;  %1108 = vrot.lane.b32.xlu2 %v3147_v54, %s2657_s14  ;;  %v1404_v2 = vsub.f32 1.0, %v1403_v58  ;;  %v1411_v48 = vand.u32 2147483647, %v1292_v40  ;;  %2500 = vpow2.f32 %v1244_v3 }
 0x25d   : > { %1824 = vperm.xlu1 %2460, %v1387_v41   ;;  %v1432_v4 = vsub.f32 1.0, %v1431_v10  ;;  %vm1421_vm0 = vweird.f32 %v3149_v14  ;;  %vm1426_vm2 = vcmp.eq.f32.partialorder %v1425_v33, 8.507059e+37  ;;  %v1428_v47 = vor.u32 1.1754944e-38, %v1427_v36 }
 0x25e   : > { %v1199_v7 = vsub.f32 0.0, %v1167_v61  ;;  %v1405_v8 = vmul.f32 %v2495_v43, %v1404_v2  ;;  %vm1412_vm14 = vcmp.eq.f32.partialorder %v1411_v48, 8.507059e+37  ;;  %vm1436_vm3 = vweird.f32 %v3156_v60 }
 0x25f   : > { %v1433_v40 = vmul.f32 %v3156_v60, %v1432_v4  ;;  %v1441_v58 = vand.u32 2147483648, %v3136_v24  ;;  %v1439_v57 = vand.u32 2147483647, %v3136_v24  ;;  %vm1437_vm5 = vmor %vm1435_vm4, %vm1436_vm3 }
 0x260   : > { %v1240_v13 = vmul.f32 1.442695, %v1199_v7  ;;  %v1406_v15 = vadd.f32 %v2495_v43, %v1405_v8 }
 0x261   : > { %v2499_v44 = vpop.eup %2498  ;;  %v1434_v56 = vadd.f32 %v3156_v60, %v1433_v40  ;;  %v1442_v3 = vor.u32 1.1754944e-38, %v1441_v58  ;;  %vm1440_vm6 = vcmp.eq.f32.partialorder %v1439_v57, 8.507059e+37 }
 0x262   : > { %2502 = vpow2.f32 %v1240_v13  ;;  %v1410_v12 = vsel %vm1409_vm13, %v2495_v43, %v1406_v15  ;;  %v1417_v22 = vmul.f32 %v2499_v44, %v3149_v14  ;;  %vm1422_vm15 = vweird.f32 %v2499_v44  ;;  %v2501_v38 = vpop.eup %2500 }
 0x263   : > { %v1083_v25 = vpop.permute.xlu1 %1082  ;;  %v1415_v26 = vsel %vm1412_vm14, %v1414_v20, %v1410_v12  ;;  %vm1423_vm1 = vmor %vm1421_vm0, %vm1422_vm15  ;;  %v3180_v28 = vadd.f32 1.0, %v2501_v38  ;;  %v1438_v61 = vsel %vm1437_vm5, %v3156_v60, %v1434_v56 }
 0x264   : > { %v1168_v27 = vsub.f32 %v3029_v53, %v1083_v25  ;;  %1829 = vperm.xlu2 %2458, %v1401_v17   ;;  %1834 = vperm.xlu0 %2459, %v1415_v26   ;;  %v1006_v31 = vpop.f32.mrf.mxu3  ;;  %v1418_v32 = vsub.f32 1.0, %v1417_v22  ;;  %v1772_v50 = vsub.f32 1.0, %v1415_v26  ;;  %v1443_v8 = vsel %vm1440_vm6, %v1442_v3, %v1438_v61 }
 0x265   : > { %2021 = vperm.xlu1 %2460, %v1771_v29   ;;  %v3177_v53 = vadd.f32 %v2957_v21, %v1006_v31  ;;  %v1774_v33 = vsub.f32 1.0, %v1443_v8  ;;  %vm1477_vm0 = vweird.f32 %v3180_v28  ;;  %v1481_v3 = vand.u32 2147483647, %v3180_v28 }
 0x266   : > { %v1200_v37 = vsub.f32 0.0, %v1168_v27  ;;  %v1419_v39 = vmul.f32 %v2499_v44, %v1418_v32 }
 0x268   : > { %v2503_v41 = vpop.eup %2502  ;;  %v1242_v30 = vmul.f32 1.442695, %v1200_v37  ;;  %v1420_v42 = vadd.f32 %v2499_v44, %v1419_v39 }
 0x269   : > { %v1295_v46 = vadd.f32 1.0, %v2503_v41 }
 0x26a   : > { %2504 = vpow2.f32 %v1242_v30  ;;  %v1424_v51 = vsel %vm1423_vm1, %v2499_v44, %v1420_v42 }
 0x26b   : > { %2506 = vrcp.f32 %v1295_v46  ;;  %v1091_v52 = vpop.permute.xlu2 %1090  ;;  %v1429_v43 = vsel %vm1426_vm2, %v1428_v47, %v1424_v51  ;;  %v1455_v13 = vand.u32 2147483648, %v1295_v46  ;;  %v1453_v17 = vand.u32 2147483647, %v1295_v46 }
 0x26c   : > { %1110 = vrot.lane.b32.xlu0 %v3177_v53, %s2657_s14  ;;  %2026 = vperm.xlu2 %2458, %v1772_v50   ;;  %v1009_v55 = vpop.f32.mrf.mxu3  ;;  %v1172_v14 = vsub.f32 %v3057_v11, %v1091_v52  ;;  %2508 = vrcp.f32 %v3180_v28  ;;  %v1773_v18 = vsub.f32 1.0, %v1429_v43  ;;  %vm1449_vm8 = vweird.f32 %v1295_v46 }
 0x26d   : > { %1839 = vperm.xlu1 %2460, %v1429_v43   ;;  %v3193_v11 = vadd.f32 %v2957_v21, %v1009_v55  ;;  %v1456_v26 = vor.u32 1.1754944e-38, %v1455_v13  ;;  %vm1454_vm10 = vcmp.eq.f32.partialorder %v1453_v17, 8.507059e+37  ;;  %vm1482_vm2 = vcmp.eq.f32.partialorder %v1481_v3, 8.507059e+37 }
 0x26e   : > { %v1204_v2 = vsub.f32 0.0, %v1172_v14 }
 0x270   : > { %v2505_v59 = vpop.eup %2504  ;;  %v1250_v10 = vmul.f32 1.442695, %v1204_v2 }
 0x271   : > { %v2507_v62 = vpop.eup %2506  ;;  %v1296_v0 = vadd.f32 1.0, %v2505_v59 }
 0x272   : > { %v1445_v6 = vmul.f32 %v2507_v62, %v1295_v46  ;;  %v3195_v48 = vpop.eup %2508  ;;  %vm1450_vm7 = vweird.f32 %v2507_v62 }
 0x273   : > { %2510 = vrcp.f32 %v1296_v0  ;;  %v1087_v7 = vpop.permute.xlu0 %1086  ;;  %v1473_v20 = vmul.f32 %v3195_v48, %v3180_v28  ;;  %vm1451_vm9 = vmor %vm1449_vm8, %vm1450_vm7  ;;  %v1467_v38 = vand.u32 2147483647, %v1296_v0  ;;  %v1469_v40 = vand.u32 2147483648, %v1296_v0 }
 0x274   : > { %v1170_v24 = vsub.f32 %v3043_v63, %v1087_v7  ;;  %2031 = vperm.xlu0 %2459, %v1773_v18   ;;  %1844 = vperm.xlu2 %2458, %v1443_v8   ;;  %v1012_v60 = vpop.f32.mrf.mxu3  ;;  %v1446_v35 = vsub.f32 1.0, %v1445_v6  ;;  %2512 = vpow2.f32 %v1250_v10  ;;  %vm1463_vm12 = vweird.f32 %v1296_v0 }
 0x275   : > { %1112 = vrot.lane.b32.xlu1 %v3193_v11, %s2657_s14  ;;  %v3203_v22 = vadd.f32 %v2957_v21, %v1012_v60  ;;  %v1474_v32 = vsub.f32 1.0, %v1473_v20  ;;  %vm1468_vm14 = vcmp.eq.f32.partialorder %v1467_v38, 8.507059e+37  ;;  %v1470_v43 = vor.u32 1.1754944e-38, %v1469_v40 }
 0x276   : > { %v1202_v15 = vsub.f32 0.0, %v1170_v24  ;;  %v1447_v44 = vmul.f32 %v2507_v62, %v1446_v35  ;;  %vm1478_vm15 = vweird.f32 %v3195_v48 }
 0x277   : > { %v1475_v46 = vmul.f32 %v3195_v48, %v1474_v32  ;;  %vm1479_vm1 = vmor %vm1477_vm0, %vm1478_vm15 }
 0x278   : > { %v1246_v12 = vmul.f32 1.442695, %v1202_v15  ;;  %v1448_v63 = vadd.f32 %v2507_v62, %v1447_v44  ;;  %v1798_v15 = vlaneseq }
 0x279   : > { %v2511_v25 = vpop.eup %2510 }
 0x27a   : > { %2514 = vpow2.f32 %v1246_v12  ;;  %v1452_v4 = vsel %vm1451_vm9, %v2507_v62, %v1448_v63  ;;  %v1459_v27 = vmul.f32 %v2511_v25, %v1296_v0  ;;  %vm1464_vm11 = vweird.f32 %v2511_v25  ;;  %v2513_v42 = vpop.eup %2512 }
 0x27b   : > { %v1089_v29 = vpop.permute.xlu1 %1088  ;;  %v1457_v31 = vsel %vm1454_vm10, %v1456_v26, %v1452_v4  ;;  %vm1465_vm13 = vmor %vm1463_vm12, %vm1464_vm11  ;;  %v3214_v55 = vadd.f32 1.0, %v2513_v42  ;;  %v1476_v62 = vadd.f32 %v3195_v48, %v1475_v46  ;;  %v1483_v0 = vand.u32 2147483648, %v3180_v28 }
 0x27c   : > { %v1171_v36 = vsub.f32 %v3050_v5, %v1089_v29  ;;  %1114 = vrot.lane.b32.xlu2 %v3203_v22, %s2657_s14  ;;  %1849 = vperm.xlu0 %2459, %v1457_v31   ;;  %v1015_v37 = vpop.f32.mrf.mxu3  ;;  %v1460_v39 = vsub.f32 1.0, %v1459_v27  ;;  %v1775_v56 = vsub.f32 1.0, %v1457_v31  ;;  %v3241_v27 = vand.u32 127, %v1798_v15 }
 0x27d   : > { %2036 = vperm.xlu1 %2460, %v1774_v33   ;;  %v3210_v51 = vadd.f32 %v2957_v21, %v1015_v37  ;;  %v1480_v6 = vsel %vm1479_vm1, %v3195_v48, %v1476_v62  ;;  %v1484_v24 = vor.u32 1.1754944e-38, %v1483_v0  ;;  %v2592_v62 = vld [vmem:[%s3637_s6] ss:$0 sm:$0xff] }
 0x27e   : > { %v1203_v41 = vsub.f32 0.0, %v1171_v36  ;;  %v1461_v30 = vmul.f32 %v2511_v25, %v1460_v39  ;;  %vm1801_vm7 = vcmp.eq.s32.totalorder %v3241_v27, 1  ;;  %vm1800_vm8 = vcmp.eq.s32.totalorder %v3241_v27, 0 }
 0x27f   : > { %v1485_v28 = vsel %vm1482_vm2, %v1484_v24, %v1480_v6 }
 0x280   : > { %v2515_v47 = vpop.eup %2514  ;;  %v1248_v50 = vmul.f32 1.442695, %v1203_v41  ;;  %v1462_v5 = vadd.f32 %v2511_v25, %v1461_v30  ;;  %v1777_v30 = vsub.f32 1.0, %v1485_v28 }
 0x281   : > { %v3212_v52 = vadd.f32 1.0, %v2515_v47 }
 0x282   : > { %2516 = vpow2.f32 %v1248_v50  ;;  %v1466_v14 = vsel %vm1465_vm13, %v2511_v25, %v1462_v5 }
 0x283   : > { %2518 = vrcp.f32 %v3212_v52  ;;  %v1097_v58 = vpop.permute.xlu2 %1096  ;;  %v1471_v57 = vsel %vm1468_vm14, %v1470_v43, %v1466_v14  ;;  %v1497_v12 = vand.u32 2147483648, %v3212_v52  ;;  %v1495_v4 = vand.u32 2147483647, %v3212_v52 }
 0x284   : > { %v1175_v59 = vsub.f32 %v3079_v45, %v1097_v58  ;;  %1116 = vrot.lane.b32.xlu0 %v3210_v51, %s2657_s14  ;;  %2041 = vperm.xlu2 %2458, %v1775_v56   ;;  %v1018_v61 = vpop.f32.mrf.mxu3  ;;  %2520 = vrcp.f32 %v3214_v55  ;;  %v1776_v60 = vsub.f32 1.0, %v1471_v57  ;;  %vm1491_vm4 = vweird.f32 %v3212_v52 }
 0x285   : > { %1854 = vperm.xlu1 %2460, %v1471_v57   ;;  %v3230_v35 = vadd.f32 %v2957_v21, %v1018_v61  ;;  %v1498_v36 = vor.u32 1.1754944e-38, %v1497_v12  ;;  %vm1496_vm6 = vcmp.eq.f32.partialorder %v1495_v4, 8.507059e+37  ;;  %vm1519_vm14 = vweird.f32 %v3214_v55 }
 0x286   : > { %v1207_v2 = vsub.f32 0.0, %v1175_v59 }
 0x288   : > { %v2517_v45 = vpop.eup %2516  ;;  %v1256_v18 = vmul.f32 1.442695, %v1207_v2 }
 0x289   : > { %v2519_v7 = vpop.eup %2518  ;;  %v3227_v8 = vadd.f32 1.0, %v2517_v45 }
 0x28a   : > { %v1487_v10 = vmul.f32 %v2519_v7, %v3212_v52  ;;  %v3234_v44 = vpop.eup %2520  ;;  %vm1492_vm3 = vweird.f32 %v2519_v7 }
 0x28b   : > { %2522 = vrcp.f32 %v3227_v8  ;;  %v1093_v13 = vpop.permute.xlu0 %1092  ;;  %vm1493_vm5 = vmor %vm1491_vm4, %vm1492_vm3  ;;  %v1509_v5 = vand.u32 2147483647, %v3227_v8  ;;  %v1511_v52 = vand.u32 2147483648, %v3227_v8  ;;  %vm1505_vm10 = vweird.f32 %v3227_v8 }
 0x28c   : > { %2524 = vpow2.f32 %v1256_v18  ;;  %v1173_v48 = vsub.f32 %v3065_v23, %v1093_v13  ;;  %2046 = vperm.xlu0 %2459, %v1776_v60   ;;  %1859 = vperm.xlu2 %2458, %v1485_v28   ;;  %v1021_v17 = vpop.f32.mrf.mxu3  ;;  %v1488_v20 = vsub.f32 1.0, %v1487_v10  ;;  %v1515_v23 = vmul.f32 %v3234_v44, %v3214_v55 }
 0x28d   : > { %1118 = vrot.lane.b32.xlu1 %v3230_v35, %s2657_s14  ;;  %v3247_v31 = vadd.f32 %v2957_v21, %v1021_v17  ;;  %v1512_v45 = vor.u32 1.1754944e-38, %v1511_v52  ;;  %vm1510_vm12 = vcmp.eq.f32.partialorder %v1509_v5, 8.507059e+37  ;;  %vm1520_vm13 = vweird.f32 %v3234_v44 }
 0x28e   : > { %v1205_v63 = vsub.f32 0.0, %v1173_v48  ;;  %v1805_v25 = vpop.permute.xlu2 %1804  ;;  %v1489_v26 = vmul.f32 %v2519_v7, %v1488_v20  ;;  %v1516_v21 = vsub.f32 1.0, %v1515_v23  ;;  %v1523_v10 = vand.u32 2147483647, %v3214_v55  ;;  %vm1521_vm15 = vmor %vm1519_vm14, %vm1520_vm13 }
 0x28f   : > { %v1962_v43 = vsel %vm1801_vm7, %v1805_v25, 0.0 }
 0x290   : > { %v1252_v29 = vmul.f32 1.442695, %v1205_v63  ;;  %v1490_v32 = vadd.f32 %v2519_v7, %v1489_v26  ;;  %v1517_v57 = vmul.f32 %v3234_v44, %v1516_v21  ;;  %vm1524_vm0 = vcmp.eq.f32.partialorder %v1523_v10, 8.507059e+37 }
 0x291   : > { %v2523_v33 = vpop.eup %2522 }
 0x292   : > { %v2525_v37 = vpop.eup %2524  ;;  %2526 = vpow2.f32 %v1252_v29  ;;  %v1494_v39 = vsel %vm1493_vm5, %v2519_v7, %v1490_v32  ;;  %v1501_v38 = vmul.f32 %v2523_v33, %v3227_v8  ;;  %vm1506_vm9 = vweird.f32 %v2523_v33 }
 0x293   : > { %v1095_v40 = vpop.permute.xlu1 %1094  ;;  %v1499_v41 = vsel %vm1496_vm6, %v1498_v36, %v1494_v39  ;;  %v3258_v47 = vadd.f32 1.0, %v2525_v37  ;;  %vm1507_vm11 = vmor %vm1505_vm10, %vm1506_vm9  ;;  %v1518_v24 = vadd.f32 %v3234_v44, %v1517_v57  ;;  %v1525_v8 = vand.u32 2147483648, %v3214_v55 }
 0x294   : > { %v1174_v42 = vsub.f32 %v3073_v34, %v1095_v40  ;;  %1120 = vrot.lane.b32.xlu2 %v3247_v31, %s2657_s14  ;;  %1864 = vperm.xlu0 %2459, %v1499_v41   ;;  %v1502_v46 = vsub.f32 1.0, %v1501_v38  ;;  %v1024_v50 = vpop.f32.mrf.mxu3  ;;  %v1778_v18 = vsub.f32 1.0, %v1499_v41 }
 0x295   : > { %2051 = vperm.xlu1 %2460, %v1777_v30   ;;  %v3273_v0 = vadd.f32 %v2592_v62, %v1024_v50  ;;  %2528 = vrcp.f32 %v3258_v47  ;;  %v1522_v17 = vsel %vm1521_vm15, %v3234_v44, %v1518_v24  ;;  %v1526_v25 = vor.u32 1.1754944e-38, %v1525_v8 }
 0x296   : > { %v1206_v56 = vsub.f32 0.0, %v1174_v42  ;;  %v1997_v34 = vpop.permute.xlu2 %1996  ;;  %v1503_v14 = vmul.f32 %v2523_v33, %v1502_v46  ;;  %vm1561_vm6 = vweird.f32 %v3258_v47  ;;  %v1567_v10 = vand.u32 2147483648, %v3258_v47 }
 0x297   : > { %v2154_v58 = vsel %vm1800_vm8, %v1997_v34, %v1962_v43 }
 0x298   : > { %v2527_v59 = vpop.eup %2526  ;;  %v1254_v61 = vmul.f32 1.442695, %v1206_v56  ;;  %2186 = vst [vmem:[%s3267_s17] sm:$0xff] %v2154_v58  ;;  %v1504_v2 = vadd.f32 %v2523_v33, %v1503_v14 }
 0x299   : > { %v1301_v3 = vadd.f32 1.0, %v2527_v59 }
 0x29a   : > { %2530 = vpow2.f32 %v1254_v61  ;;  %v1508_v6 = vsel %vm1507_vm11, %v2523_v33, %v1504_v2 }
 0x29b   : > { %2532 = vrcp.f32 %v1301_v3  ;;  %v1513_v7 = vsel %vm1510_vm12, %v1512_v45, %v1508_v6  ;;  %v3284_v13 = vpop.eup %2528  ;;  %v1539_v36 = vand.u32 2147483648, %v1301_v3  ;;  %v1537_v40 = vand.u32 2147483647, %v1301_v3 }
 0x29c   : > { %1122 = vrot.lane.b32.xlu0 %v3273_v0, %s2657_s14  ;;  %2056 = vperm.xlu2 %2458, %v1778_v18   ;;  %v1027_v15 = vpop.f32.mrf.mxu3  ;;  %v1779_v26 = vsub.f32 1.0, %v1513_v7  ;;  %v1557_v32 = vmul.f32 %v3284_v13, %v3258_v47  ;;  %vm1533_vm2 = vweird.f32 %v1301_v3  ;;  %vm1562_vm9 = vweird.f32 %v3284_v13 }
 0x29d   : > { %1869 = vperm.xlu1 %2460, %v1513_v7   ;;  %v3290_v4 = vadd.f32 %v2592_v62, %v1027_v15  ;;  %vm1538_vm4 = vcmp.eq.f32.partialorder %v1537_v40, 8.507059e+37  ;;  %vm1563_vm13 = vmor %vm1561_vm6, %vm1562_vm9 }
 0x29e   : > { %v1103_v60 = vpop.permute.xlu2 %1102  ;;  %v1558_v41 = vsub.f32 1.0, %v1557_v32 }
 0x29f   : > { %v1178_v28 = vsub.f32 %v3109_v49, %v1103_v60  ;;  %v1527_v49 = vsel %vm1524_vm0, %v1526_v25, %v1522_v17  ;;  %v1568_v25 = vor.u32 1.1754944e-38, %v1567_v10 }
 0x2a0   : > { %v2531_v48 = vpop.eup %2530  ;;  %v1559_v56 = vmul.f32 %v3284_v13, %v1558_v41  ;;  %v1780_v34 = vsub.f32 1.0, %v1527_v49 }
 0x2a1   : > { %v2533_v20 = vpop.eup %2532  ;;  %v3288_v12 = vadd.f32 1.0, %v2531_v48  ;;  %v1210_v63 = vsub.f32 0.0, %v1178_v28  ;;  %v1565_v48 = vand.u32 2147483647, %v3258_v47 }
 0x2a2   : > { %v1529_v23 = vmul.f32 %v2533_v20, %v1301_v3  ;;  %vm1534_vm1 = vweird.f32 %v2533_v20  ;;  %v1560_v6 = vadd.f32 %v3284_v13, %v1559_v56 }
 0x2a3   : > { %2534 = vrcp.f32 %v3288_v12  ;;  %v1262_v55 = vmul.f32 1.442695, %v1210_v63  ;;  %v1099_v29 = vpop.permute.xlu0 %1098  ;;  %vm1535_vm3 = vmor %vm1533_vm2, %vm1534_vm1  ;;  %v1551_v61 = vand.u32 2147483647, %v3288_v12  ;;  %v1553_v62 = vand.u32 2147483648, %v3288_v12 }
 0x2a4   : > { %v1176_v44 = vsub.f32 %v3086_v1, %v1099_v29  ;;  %2061 = vperm.xlu0 %2459, %v1779_v26   ;;  %1874 = vperm.xlu2 %2458, %v1527_v49   ;;  %v1530_v33 = vsub.f32 1.0, %v1529_v23  ;;  %v1540_v1 = vor.u32 1.1754944e-38, %v1539_v36  ;;  %vm1547_vm10 = vweird.f32 %v3288_v12 }
 0x2a5   : > { %2536 = vpow2.f32 %v1262_v55  ;;  %1124 = vrot.lane.b32.xlu1 %v3290_v4, %s2657_s14  ;;  %v1554_v15 = vor.u32 1.1754944e-38, %v1553_v62  ;;  %vm1552_vm12 = vcmp.eq.f32.partialorder %v1551_v61, 8.507059e+37  ;;  %vm1566_vm14 = vcmp.eq.f32.partialorder %v1565_v48, 8.507059e+37 }
 0x2a6   : > { %v1208_v37 = vsub.f32 0.0, %v1176_v44  ;;  %v1820_v39 = vpop.permute.xlu2 %1819  ;;  %v1531_v38 = vmul.f32 %v2533_v20, %v1530_v33 }
 0x2a7   : > { %v1965_v2 = vsel %vm1801_vm7, %v1820_v39, 0.0 }
 0x2a8   : > { %v1258_v21 = vmul.f32 1.442695, %v1208_v37  ;;  %v1532_v30 = vadd.f32 %v2533_v20, %v1531_v38 }
 0x2a9   : > { %v2535_v42 = vpop.eup %2534 }
 0x2aa   : > { %2538 = vpow2.f32 %v1258_v21  ;;  %v1536_v46 = vsel %vm1535_vm3, %v2533_v20, %v1532_v30  ;;  %v1543_v50 = vmul.f32 %v2535_v42, %v3288_v12  ;;  %vm1548_vm5 = vweird.f32 %v2535_v42 }
 0x2ab   : > { %v2537_v5 = vpop.eup %2536  ;;  %v1101_v52 = vpop.permute.xlu1 %1100  ;;  %v1541_v43 = vsel %vm1538_vm4, %v1540_v1, %v1536_v46  ;;  %vm1549_vm11 = vmor %vm1547_vm10, %vm1548_vm5  ;;  %v1564_v12 = vsel %vm1563_vm13, %v3284_v13, %v1560_v6 }
 0x2ac   : > { %v1177_v14 = vsub.f32 %v3094_v19, %v1101_v52  ;;  %1879 = vperm.xlu0 %2459, %v1541_v43   ;;  %v1781_v58 = vsub.f32 1.0, %v1541_v43  ;;  %v1544_v57 = vsub.f32 1.0, %v1543_v50  ;;  %v3301_v59 = vadd.f32 1.0, %v2537_v5 }
 0x2ad   : > { %2066 = vperm.xlu1 %2460, %v1780_v34   ;;  %v1569_v23 = vsel %vm1566_vm14, %v1568_v25, %v1564_v12 }
 0x2ae   : > { %v1209_v3 = vsub.f32 0.0, %v1177_v14  ;;  %v2012_v45 = vpop.permute.xlu2 %2011  ;;  %2071 = vperm.xlu2 %2458, %v1781_v58   ;;  %v1545_v18 = vmul.f32 %v2535_v42, %v1544_v57  ;;  %2540 = vrcp.f32 %v3301_v59  ;;  %v1783_v40 = vsub.f32 1.0, %v1569_v23 }
 0x2af   : > { %v2157_v19 = vsel %vm1800_vm8, %v2012_v45, %v1965_v2  ;;  %vm1603_vm5 = vweird.f32 %v3301_v59  ;;  %v1609_v10 = vand.u32 2147483648, %v3301_v59 }
 0x2b0   : > { %v2539_v7 = vpop.eup %2538  ;;  %v1260_v24 = vmul.f32 1.442695, %v1209_v3  ;;  %2189 = vst [vmem:[%s3267_s17 + $0x18] sm:$0xff] %v2157_v19  ;;  %v1810_v8 = vpop.permute.xlu0 %1809  ;;  %v1546_v60 = vadd.f32 %v2535_v42, %v1545_v18 }
 0x2b1   : > { %v1304_v28 = vadd.f32 1.0, %v2539_v7  ;;  %v1963_v47 = vsel %vm1801_vm7, %v1810_v8, 0.0 }
 0x2b2   : > { %2542 = vpow2.f32 %v1260_v24  ;;  %v1550_v17 = vsel %vm1549_vm11, %v2535_v42, %v1546_v60 }
 0x2b3   : > { %2544 = vrcp.f32 %v1304_v28  ;;  %v1555_v20 = vsel %vm1552_vm12, %v1554_v15, %v1550_v17  ;;  %v1581_v21 = vand.u32 2147483648, %v1304_v28  ;;  %v1579_v1 = vand.u32 2147483647, %v1304_v28 }
 0x2b4   : > { %v1782_v63 = vsub.f32 1.0, %v1555_v20  ;;  %v3322_v55 = vpop.eup %2540  ;;  %vm1575_vm0 = vweird.f32 %v1304_v28  ;;  %v1607_v17 = vand.u32 2147483647, %v3301_v59 }
 0x2b5   : > { %1884 = vperm.xlu1 %2460, %v1555_v20   ;;  %v1599_v38 = vmul.f32 %v3322_v55, %v3301_v59  ;;  %v1582_v58 = vor.u32 1.1754944e-38, %v1581_v21  ;;  %vm1580_vm2 = vcmp.eq.f32.partialorder %v1579_v1, 8.507059e+37  ;;  %vm1604_vm3 = vweird.f32 %v3322_v55 }
 0x2b6   : > { %v1109_v26 = vpop.permute.xlu2 %1108  ;;  %2076 = vperm.xlu0 %2459, %v1782_v63   ;;  %1889 = vperm.xlu2 %2458, %v1569_v23   ;;  %vm3345_vm9 = vmor %vm1603_vm5, %vm1604_vm3  ;;  %vm1608_vm12 = vcmp.eq.f32.partialorder %v1607_v17, 8.507059e+37 }
 0x2b7   : > { %v1181_v29 = vsub.f32 %v3147_v54, %v1109_v26  ;;  %v1815_v32 = vpop.permute.xlu1 %1814  ;;  %v1600_v46 = vsub.f32 1.0, %v1599_v38 }
 0x2b8   : > { %v2543_v49 = vpop.eup %2542  ;;  %v2002_v44 = vpop.permute.xlu0 %2001  ;;  %v1964_v50 = vsel %vm1801_vm7, %v1815_v32, 0.0 }
 0x2b9   : > { %v2545_v13 = vpop.eup %2544  ;;  %v1305_v33 = vadd.f32 1.0, %v2543_v49  ;;  %v1213_v36 = vsub.f32 0.0, %v1181_v29  ;;  %v2155_v37 = vsel %vm1800_vm8, %v2002_v44, %v1963_v47  ;;  %v1601_v62 = vmul.f32 %v3322_v55, %v1600_v46 }
 0x2ba   : > { %2187 = vst [vmem:[%s3267_s17 + $0x8] sm:$0xff] %v2155_v37  ;;  %v1571_v39 = vmul.f32 %v2545_v13, %v1304_v28  ;;  %vm1576_vm15 = vweird.f32 %v2545_v13  ;;  %v1610_v49 = vor.u32 1.1754944e-38, %v1609_v10 }
 0x2bb   : > { %2546 = vrcp.f32 %v1305_v33  ;;  %v1268_v54 = vmul.f32 1.442695, %v1213_v36  ;;  %vm1577_vm1 = vmor %vm1575_vm0, %vm1576_vm15  ;;  %v1595_v6 = vand.u32 2147483648, %v1305_v33  ;;  %v1593_v8 = vand.u32 2147483647, %v1305_v33 }
 0x2bc   : > { %v1572_v41 = vsub.f32 1.0, %v1571_v39  ;;  %v1602_v60 = vadd.f32 %v3322_v55, %v1601_v62  ;;  %vm1589_vm6 = vweird.f32 %v1305_v33 }
 0x2bd   : > { %2081 = vperm.xlu1 %2460, %v1783_v40   ;;  %2548 = vpow2.f32 %v1268_v54  ;;  %v1596_v63 = vor.u32 1.1754944e-38, %v1595_v6  ;;  %vm1594_vm11 = vcmp.eq.f32.partialorder %v1593_v8, 8.507059e+37 }
 0x2be   : > { %v3332_v30 = vpop.permute.xlu2 %1829  ;;  %v1573_v42 = vmul.f32 %v2545_v13, %v1572_v41  ;;  %v1606_v26 = vsel %vm3345_vm9, %v3322_v55, %v1602_v60 }
 0x2bf   : > { %v2007_v5 = vpop.permute.xlu1 %2006 }
 0x2c0   : > { %v1105_v52 = vpop.permute.xlu0 %1104  ;;  %v1574_v43 = vadd.f32 %v2545_v13, %v1573_v42  ;;  %v2156_v34 = vsel %vm1800_vm8, %v2007_v5, %v1964_v50 }
 0x2c1   : > { %v2547_v56 = vpop.eup %2546  ;;  %v1179_v14 = vsub.f32 %v3125_v16, %v1105_v52  ;;  %2188 = vst [vmem:[%s3267_s17 + $0x10] sm:$0xff] %v2156_v34  ;;  %v1967_v52 = vsel %vm1801_vm7, %v3332_v30, 0.0 }
 0x2c2   : > { %v1578_v57 = vsel %vm1577_vm1, %v2545_v13, %v1574_v43  ;;  %v1585_v61 = vmul.f32 %v2547_v56, %v1305_v33  ;;  %vm1590_vm4 = vweird.f32 %v2547_v56 }
 0x2c3   : > { %v1211_v2 = vsub.f32 0.0, %v1179_v14  ;;  %v1583_v3 = vsel %vm1580_vm2, %v1582_v58, %v1578_v57  ;;  %v2549_v7 = vpop.eup %2548  ;;  %vm1591_vm10 = vmor %vm1589_vm6, %vm1590_vm4 }
 0x2c4   : > { %1894 = vperm.xlu0 %2459, %v1583_v3   ;;  %v1784_v45 = vsub.f32 1.0, %v1583_v3  ;;  %v1586_v18 = vsub.f32 1.0, %v1585_v61  ;;  %v3350_v20 = vadd.f32 1.0, %v2549_v7 }
 0x2c5   : > { %v1264_v19 = vmul.f32 1.442695, %v1211_v2 }
 0x2c6   : > { %v2027_v24 = vpop.permute.xlu2 %2026  ;;  %2086 = vperm.xlu2 %2458, %v1784_v45   ;;  %v1587_v16 = vmul.f32 %v2547_v56, %v1586_v18  ;;  %vm1645_vm3 = vweird.f32 %v3350_v20 }
 0x2c7   : > { %2550 = vpow2.f32 %v1264_v19  ;;  %v1107_v28 = vpop.permute.xlu1 %1106 }
 0x2c8   : > { %v1588_v15 = vadd.f32 %v2547_v56, %v1587_v16  ;;  %v1180_v12 = vsub.f32 %v3139_v9, %v1107_v28  ;;  %2552 = vrcp.f32 %v3350_v20  ;;  %v1611_v9 = vsel %vm1608_vm12, %v1610_v49, %v1606_v26  ;;  %v2017_v13 = vpop.permute.xlu0 %2016 }
 0x2c9   : > { %v1786_v39 = vsub.f32 1.0, %v1611_v9  ;;  %v1649_v49 = vand.u32 2147483647, %v3350_v20 }
 0x2ca   : > { %v1592_v25 = vsel %vm1591_vm10, %v2547_v56, %v1588_v15  ;;  %v1212_v23 = vsub.f32 0.0, %v1180_v12 }
 0x2cb   : > { %v1597_v29 = vsel %vm1594_vm11, %v1596_v63, %v1592_v25  ;;  %v1651_v25 = vand.u32 2147483648, %v3350_v20  ;;  %vm1650_vm10 = vcmp.eq.f32.partialorder %v1649_v49, 8.507059e+37 }
 0x2cc   : > { %1899 = vperm.xlu1 %2460, %v1597_v29   ;;  %v1785_v47 = vsub.f32 1.0, %v1597_v29  ;;  %v1266_v59 = vmul.f32 1.442695, %v1212_v23 }
 0x2cd   : > { %v2551_v32 = vpop.eup %2550 }
 0x2ce   : > { %v1307_v44 = vadd.f32 1.0, %v2551_v32  ;;  %v3357_v33 = vpop.permute.xlu2 %1844  ;;  %2091 = vperm.xlu0 %2459, %v1785_v47   ;;  %1904 = vperm.xlu2 %2458, %v1611_v9   ;;  %2554 = vpow2.f32 %v1266_v59  ;;  %v3363_v38 = vpop.eup %2552 }
 0x2cf   : > { %v1825_v55 = vpop.permute.xlu1 %1824  ;;  %v1641_v1 = vmul.f32 %v3363_v38, %v3350_v20  ;;  %vm1646_vm1 = vweird.f32 %v3363_v38 }
 0x2d0   : > { %2556 = vrcp.f32 %v1307_v44  ;;  %v1966_v36 = vsel %vm1801_vm7, %v1825_v55, 0.0  ;;  %v1621_v58 = vand.u32 2147483647, %v1307_v44  ;;  %v1623_v57 = vand.u32 2147483648, %v1307_v44  ;;  %vm3395_vm5 = vmor %vm1645_vm3, %vm1646_vm1 }
 0x2d1   : > { %v2158_v37 = vsel %vm1800_vm8, %v2017_v13, %v1966_v36  ;;  %v1642_v61 = vsub.f32 1.0, %v1641_v1  ;;  %vm1617_vm14 = vweird.f32 %v1307_v44 }
 0x2d2   : > { %2190 = vst [vmem:[%s3267_s17 + $0x20] sm:$0xff] %v2158_v37  ;;  %vm1622_vm0 = vcmp.eq.f32.partialorder %v1621_v58, 8.507059e+37  ;;  %v1624_v19 = vor.u32 1.1754944e-38, %v1623_v57 }
 0x2d3   : > { %v1643_v6 = vmul.f32 %v3363_v38, %v1642_v61 }
 0x2d4   : > { %2096 = vperm.xlu1 %2460, %v1786_v39   ;;  %v2555_v54 = vpop.eup %2554  ;;  %v1652_v39 = vor.u32 1.1754944e-38, %v1651_v25 }
 0x2d5   : > { %v3366_v41 = vadd.f32 1.0, %v2555_v54  ;;  %v1644_v17 = vadd.f32 %v3363_v38, %v1643_v6 }
 0x2d6   : > { %v2557_v40 = vpop.eup %2556  ;;  %v1115_v21 = vpop.permute.xlu2 %1114 }
 0x2d7   : > { %v1835_v42 = vpop.permute.xlu0 %1834  ;;  %v1184_v46 = vsub.f32 %v3203_v22, %v1115_v21  ;;  %v1613_v5 = vmul.f32 %v2557_v40, %v1307_v44  ;;  %2558 = vrcp.f32 %v3366_v41  ;;  %v2022_v43 = vpop.permute.xlu1 %2021  ;;  %vm1618_vm13 = vweird.f32 %v2557_v40 }
 0x2d8   : > { %v1968_v50 = vsel %vm1801_vm7, %v1835_v42, 0.0  ;;  %v2159_v34 = vsel %vm1800_vm8, %v2022_v43, %v1967_v52  ;;  %vm1619_vm15 = vmor %vm1617_vm14, %vm1618_vm13  ;;  %v1637_v48 = vand.u32 2147483648, %v3366_v41  ;;  %vm1631_vm4 = vweird.f32 %v3366_v41 }
 0x2d9   : > { %v2160_v56 = vsel %vm1800_vm8, %v2027_v24, %v1968_v50  ;;  %v1216_v14 = vsub.f32 0.0, %v1184_v46  ;;  %v1614_v22 = vsub.f32 1.0, %v1613_v5  ;;  %2191 = vst [vmem:[%s3267_s17 + $0x28] sm:$0xff] %v2159_v34  ;;  %v1648_v55 = vsel %vm3395_vm5, %v3363_v38, %v1644_v17 }
 0x2da   : > { %2192 = vst [vmem:[%s3267_s17 + $0x30] sm:$0xff] %v2160_v56  ;;  %v1638_v9 = vor.u32 1.1754944e-38, %v1637_v48  ;;  %v1970_v43 = vsel %vm1801_vm7, %v3357_v33, 0.0 }
 0x2db   : > { %v1274_v62 = vmul.f32 1.442695, %v1216_v14  ;;  %v1615_v2 = vmul.f32 %v2557_v40, %v1614_v22 }
 0x2dd   : > { %v1616_v30 = vadd.f32 %v2557_v40, %v1615_v2  ;;  %v2559_v3 = vpop.eup %2558  ;;  %2560 = vpow2.f32 %v1274_v62 }
 0x2de   : > { %v3383_v45 = vpop.permute.xlu2 %2041  ;;  %v1627_v16 = vmul.f32 %v2559_v3, %v3366_v41  ;;  %vm1632_vm2 = vweird.f32 %v2559_v3 }
 0x2df   : > { %v1111_v18 = vpop.permute.xlu0 %1110  ;;  %v1620_v24 = vsel %vm1619_vm15, %v2557_v40, %v1616_v30  ;;  %v1840_v8 = vpop.permute.xlu1 %1839  ;;  %vm1633_vm6 = vmor %vm1631_vm4, %vm1632_vm2 }
 0x2e0   : > { %v1182_v7 = vsub.f32 %v3177_v53, %v1111_v18  ;;  %v1625_v60 = vsel %vm1622_vm0, %v1624_v19, %v1620_v24  ;;  %v1628_v15 = vsub.f32 1.0, %v1627_v16  ;;  %v1635_v53 = vand.u32 2147483647, %v3366_v41 }
 0x2e1   : > { %1909 = vperm.xlu0 %2459, %v1625_v60   ;;  %v1787_v28 = vsub.f32 1.0, %v1625_v60  ;;  %v1969_v47 = vsel %vm1801_vm7, %v1840_v8, 0.0  ;;  %v1653_v41 = vsel %vm1650_vm10, %v1652_v39, %v1648_v55 }
 0x2e2   : > { %v1214_v10 = vsub.f32 0.0, %v1182_v7  ;;  %v1629_v63 = vmul.f32 %v2559_v3, %v1628_v15  ;;  %vm1636_vm9 = vcmp.eq.f32.partialorder %v1635_v53, 8.507059e+37  ;;  %v1789_v5 = vsub.f32 1.0, %v1653_v41 }
 0x2e3   : > { %2101 = vperm.xlu2 %2458, %v1787_v28   ;;  %v2561_v26 = vpop.eup %2560 }
 0x2e4   : > { %v1270_v12 = vmul.f32 1.442695, %v1214_v10  ;;  %v1630_v23 = vadd.f32 %v2559_v3, %v1629_v63  ;;  %v3409_v36 = vadd.f32 1.0, %v2561_v26 }
 0x2e6   : > { %2562 = vpow2.f32 %v1270_v12  ;;  %v3402_v32 = vpop.permute.xlu2 %1859  ;;  %v1634_v13 = vsel %vm1633_vm6, %v2559_v3, %v1630_v23  ;;  %vm1687_vm0 = vweird.f32 %v3409_v36 }
 0x2e7   : > { %v2032_v59 = vpop.permute.xlu0 %2031  ;;  %v1113_v20 = vpop.permute.xlu1 %1112  ;;  %v1639_v37 = vsel %vm1636_vm9, %v1638_v9, %v1634_v13  ;;  %2564 = vrcp.f32 %v3409_v36  ;;  %v1693_v13 = vand.u32 2147483648, %v3409_v36 }
 0x2e8   : > { %v2161_v44 = vsel %vm1800_vm8, %v2032_v59, %v1969_v47  ;;  %v1183_v54 = vsub.f32 %v3193_v11, %v1113_v20  ;;  %v1788_v40 = vsub.f32 1.0, %v1639_v37  ;;  %1914 = vperm.xlu1 %2460, %v1639_v37  }
 0x2e9   : > { %2193 = vst [vmem:[%s3267_s17 + $0x38] sm:$0xff] %v2161_v44  ;;  %v1691_v44 = vand.u32 2147483647, %v3409_v36 }
 0x2ea   : > { %v1215_v42 = vsub.f32 0.0, %v1183_v54  ;;  %2106 = vperm.xlu0 %2459, %v1788_v40  }
 0x2eb   : > { %1919 = vperm.xlu2 %2458, %v1653_v41   ;;  %vm1692_vm5 = vcmp.eq.f32.partialorder %v1691_v44, 8.507059e+37 }
 0x2ec   : > { %v2563_v21 = vpop.eup %2562  ;;  %v1272_v1 = vmul.f32 1.442695, %v1215_v42 }
 0x2ed   : > { %v1310_v38 = vadd.f32 1.0, %v2563_v21  ;;  %v3426_v58 = vpop.eup %2564 }
 0x2ee   : > { %v1121_v46 = vpop.permute.xlu2 %1120  ;;  %v1683_v33 = vmul.f32 %v3426_v58, %v3409_v36  ;;  %vm1688_vm15 = vweird.f32 %v3426_v58 }
 0x2ef   : > { %2566 = vrcp.f32 %v1310_v38  ;;  %v1850_v50 = vpop.permute.xlu0 %1849  ;;  %v1187_v11 = vsub.f32 %v3247_v31, %v1121_v46  ;;  %v2037_v56 = vpop.permute.xlu1 %2036  ;;  %v1663_v19 = vand.u32 2147483647, %v1310_v38  ;;  %v1665_v6 = vand.u32 2147483648, %v1310_v38  ;;  %vm3453_vm2 = vmor %vm1687_vm0, %vm1688_vm15 }
 0x2f0   : > { %2568 = vpow2.f32 %v1272_v1  ;;  %v1971_v52 = vsel %vm1801_vm7, %v1850_v50, 0.0  ;;  %v2162_v14 = vsel %vm1800_vm8, %v2037_v56, %v1970_v43  ;;  %2111 = vperm.xlu1 %2460, %v1789_v5   ;;  %v1684_v16 = vsub.f32 1.0, %v1683_v33 }
 0x2f1   : > { %v2163_v34 = vsel %vm1800_vm8, %v3383_v45, %v1971_v52  ;;  %v1219_v22 = vsub.f32 0.0, %v1187_v11  ;;  %2194 = vst [vmem:[%s3267_s17 + $0x40] sm:$0xff] %v2162_v14  ;;  %vm1659_vm12 = vweird.f32 %v1310_v38  ;;  %v1666_v10 = vor.u32 1.1754944e-38, %v1665_v6 }
 0x2f2   : > { %2195 = vst [vmem:[%s3267_s17 + $0x48] sm:$0xff] %v2163_v34  ;;  %vm1664_vm14 = vcmp.eq.f32.partialorder %v1663_v19, 8.507059e+37  ;;  %v1973_v5 = vsel %vm1801_vm7, %v3402_v32, 0.0 }
 0x2f3   : > { %v1280_v31 = vmul.f32 1.442695, %v1219_v22 }
 0x2f5   : > { %v2567_v57 = vpop.eup %2566  ;;  %2570 = vpow2.f32 %v1280_v31 }
 0x2f6   : > { %v2569_v61 = vpop.eup %2568  ;;  %v1655_v62 = vmul.f32 %v2567_v57, %v1310_v38  ;;  %vm1660_vm11 = vweird.f32 %v2567_v57  ;;  %v1694_v38 = vor.u32 1.1754944e-38, %v1693_v13  ;;  %v2057_v1 = vpop.permute.xlu2 %2056 }
 0x2f7   : > { %v3431_v2 = vadd.f32 1.0, %v2569_v61  ;;  %v1117_v30 = vpop.permute.xlu0 %1116  ;;  %v1855_v18 = vpop.permute.xlu1 %1854  ;;  %vm1661_vm13 = vmor %vm1659_vm12, %vm1660_vm11 }
 0x2f8   : > { %v1185_v3 = vsub.f32 %v3210_v51, %v1117_v30  ;;  %v1656_v45 = vsub.f32 1.0, %v1655_v62  ;;  %v1685_v51 = vmul.f32 %v3426_v58, %v1684_v16  ;;  %v1972_v17 = vsel %vm1801_vm7, %v1855_v18, 0.0 }
 0x2f9   : > { %2572 = vrcp.f32 %v3431_v2  ;;  %v1679_v9 = vand.u32 2147483648, %v3431_v2  ;;  %vm1673_vm3 = vweird.f32 %v3431_v2 }
 0x2fa   : > { %v1217_v7 = vsub.f32 0.0, %v1185_v3  ;;  %v1657_v24 = vmul.f32 %v2567_v57, %v1656_v45  ;;  %v1686_v59 = vadd.f32 %v3426_v58, %v1685_v51 }
 0x2fb   : > { %v2571_v28 = vpop.eup %2570  ;;  %v1680_v42 = vor.u32 1.1754944e-38, %v1679_v9 }
 0x2fc   : > { %v1276_v8 = vmul.f32 1.442695, %v1217_v7  ;;  %v1658_v60 = vadd.f32 %v2567_v57, %v1657_v24  ;;  %v3441_v23 = vadd.f32 1.0, %v2571_v28  ;;  %v1690_v36 = vsel %vm3453_vm2, %v3426_v58, %v1686_v59 }
 0x2fd   : > { %v1695_v56 = vsel %vm1692_vm5, %v1694_v38, %v1690_v36 }
 0x2fe   : > { %2574 = vpow2.f32 %v1276_v8  ;;  %v1662_v15 = vsel %vm1661_vm13, %v2567_v57, %v1658_v60  ;;  %v1792_v33 = vsub.f32 1.0, %v1695_v56  ;;  %v1735_v59 = vand.u32 2147483648, %v3441_v23 }
 0x2ff   : > { %v2573_v48 = vpop.eup %2572  ;;  %v2047_v12 = vpop.permute.xlu0 %2046  ;;  %v1667_v63 = vsel %vm1664_vm14, %v1666_v10, %v1662_v15  ;;  %2576 = vrcp.f32 %v3441_v23  ;;  %vm1729_vm14 = vweird.f32 %v3441_v23 }
 0x300   : > { %v2164_v53 = vsel %vm1800_vm8, %v2047_v12, %v1972_v17  ;;  %1924 = vperm.xlu0 %2459, %v1667_v63   ;;  %v1790_v25 = vsub.f32 1.0, %v1667_v63  ;;  %v1669_v26 = vmul.f32 %v2573_v48, %v3431_v2  ;;  %v1119_v29 = vpop.permute.xlu1 %1118  ;;  %vm1674_vm1 = vweird.f32 %v2573_v48 }
 0x301   : > { %2196 = vst [vmem:[%s3267_s17 + $0x50] sm:$0xff] %v2164_v53  ;;  %v1186_v49 = vsub.f32 %v3230_v35, %v1119_v29  ;;  %v1677_v35 = vand.u32 2147483647, %v3431_v2  ;;  %vm1675_vm4 = vmor %vm1673_vm3, %vm1674_vm1 }
 0x302   : > { %2116 = vperm.xlu2 %2458, %v1790_v25   ;;  %v1670_v47 = vsub.f32 1.0, %v1669_v26 }
 0x303   : > { %v1218_v20 = vsub.f32 0.0, %v1186_v49  ;;  %vm1678_vm6 = vcmp.eq.f32.partialorder %v1677_v35, 8.507059e+37 }
 0x304   : > { %v2575_v55 = vpop.eup %2574  ;;  %v1671_v37 = vmul.f32 %v2573_v48, %v1670_v47  ;;  %v1733_v47 = vand.u32 2147483647, %v3441_v23 }
 0x305   : > { %v1313_v39 = vadd.f32 1.0, %v2575_v55  ;;  %v1278_v40 = vmul.f32 1.442695, %v1218_v20  ;;  %v3471_v22 = vpop.eup %2576 }
 0x306   : > { %v1672_v41 = vadd.f32 %v2573_v48, %v1671_v37  ;;  %v1725_v57 = vmul.f32 %v3471_v22, %v3441_v23  ;;  %vm1730_vm13 = vweird.f32 %v3471_v22  ;;  %vm1734_vm3 = vcmp.eq.f32.partialorder %v1733_v47, 8.507059e+37 }
 0x307   : > { %2578 = vrcp.f32 %v1313_v39  ;;  %v1865_v21 = vpop.permute.xlu0 %1864  ;;  %v1705_v45 = vand.u32 2147483647, %v1313_v39  ;;  %v1707_v18 = vand.u32 2147483648, %v1313_v39  ;;  %vm1701_vm10 = vweird.f32 %v1313_v39  ;;  %vm3495_vm0 = vmor %vm1729_vm14, %vm1730_vm13 }
 0x308   : > { %2580 = vpow2.f32 %v1278_v40  ;;  %v1974_v46 = vsel %vm1801_vm7, %v1865_v21, 0.0  ;;  %v1676_v50 = vsel %vm1675_vm4, %v2573_v48, %v1672_v41  ;;  %v2052_v11 = vpop.permute.xlu1 %2051  ;;  %v1726_v7 = vsub.f32 1.0, %v1725_v57  ;;  %v1875_v48 = vpop.permute.xlu2 %1874 }
 0x309   : > { %v2166_v52 = vsel %vm1800_vm8, %v2057_v1, %v1974_v46  ;;  %v1681_v43 = vsel %vm1678_vm6, %v1680_v42, %v1676_v50  ;;  %v2165_v34 = vsel %vm1800_vm8, %v2052_v11, %v1973_v5  ;;  %v1708_v8 = vor.u32 1.1754944e-38, %v1707_v18 }
 0x30a   : > { %2198 = vst [vmem:[%s3267_s17 + $0x60] sm:$0xff] %v2166_v52  ;;  %v1791_v14 = vsub.f32 1.0, %v1681_v43  ;;  %1929 = vperm.xlu1 %2460, %v1681_v43   ;;  %1934 = vperm.xlu2 %2458, %v1695_v56   ;;  %vm1706_vm12 = vcmp.eq.f32.partialorder %v1705_v45, 8.507059e+37  ;;  %v1736_v40 = vor.u32 1.1754944e-38, %v1735_v59  ;;  %v1976_v42 = vsel %vm1801_vm7, %v1875_v48, 0.0 }
 0x30b   : > { %2197 = vst [vmem:[%s3267_s17 + $0x58] sm:$0xff] %v2165_v34 }
 0x30c   : > { %2121 = vperm.xlu0 %2459, %v1791_v14  }
 0x30d   : > { %v2579_v58 = vpop.eup %2578 }
 0x30e   : > { %v2581_v31 = vpop.eup %2580  ;;  %v1697_v32 = vmul.f32 %v2579_v58, %v1313_v39  ;;  %vm1702_vm9 = vweird.f32 %v2579_v58 }
 0x30f   : > { %v3476_v61 = vadd.f32 1.0, %v2581_v31  ;;  %v1123_v62 = vpop.permute.xlu0 %1122  ;;  %vm1703_vm11 = vmor %vm1701_vm10, %vm1702_vm9 }
 0x310   : > { %v1188_v2 = vsub.f32 %v3273_v0, %v1123_v62  ;;  %v1698_v30 = vsub.f32 1.0, %v1697_v32  ;;  %v1870_v3 = vpop.permute.xlu1 %1869  ;;  %v1727_v0 = vmul.f32 %v3471_v22, %v1726_v7  ;;  %v2072_v41 = vpop.permute.xlu2 %2071 }
 0x311   : > { %2582 = vrcp.f32 %v3476_v61  ;;  %v1975_v28 = vsel %vm1801_vm7, %v1870_v3, 0.0  ;;  %v1721_v49 = vand.u32 2147483648, %v3476_v61  ;;  %vm1715_vm1 = vweird.f32 %v3476_v61 }
 0x312   : > { %v1220_v19 = vsub.f32 0.0, %v1188_v2  ;;  %2126 = vperm.xlu1 %2460, %v1792_v33   ;;  %v1699_v6 = vmul.f32 %v2579_v58, %v1698_v30  ;;  %v1728_v29 = vadd.f32 %v3471_v22, %v1727_v0 }
 0x313   : > { %v1722_v54 = vor.u32 1.1754944e-38, %v1721_v49 }
 0x314   : > { %v1282_v24 = vmul.f32 1.442695, %v1220_v19  ;;  %v1700_v16 = vadd.f32 %v2579_v58, %v1699_v6  ;;  %v1732_v39 = vsel %vm3495_vm0, %v3471_v22, %v1728_v29 }
 0x315   : > { %v3509_v50 = vsel %vm1734_vm3, %v1736_v40, %v1732_v39 }
 0x316   : > { %2584 = vpow2.f32 %v1282_v24  ;;  %v1704_v60 = vsel %vm1703_vm11, %v2579_v58, %v1700_v16  ;;  %v1795_v29 = vsub.f32 1.0, %v3509_v50 }
 0x317   : > { %v2583_v10 = vpop.eup %2582  ;;  %v2062_v15 = vpop.permute.xlu0 %2061  ;;  %v1709_v51 = vsel %vm1706_vm12, %v1708_v8, %v1704_v60 }
 0x318   : > { %v2167_v17 = vsel %vm1800_vm8, %v2062_v15, %v1975_v28  ;;  %1939 = vperm.xlu0 %2459, %v1709_v51   ;;  %v1793_v12 = vsub.f32 1.0, %v1709_v51  ;;  %v1711_v63 = vmul.f32 %v2583_v10, %v3476_v61  ;;  %v1125_v53 = vpop.permute.xlu1 %1124  ;;  %vm1716_vm15 = vweird.f32 %v2583_v10  ;;  %v1890_v30 = vpop.permute.xlu2 %1889 }
 0x319   : > { %2199 = vst [vmem:[%s3267_s17 + $0x68] sm:$0xff] %v2167_v17  ;;  %v1189_v25 = vsub.f32 %v3290_v4, %v1125_v53  ;;  %v1719_v4 = vand.u32 2147483647, %v3476_v61  ;;  %vm1717_vm2 = vmor %vm1715_vm1, %vm1716_vm15  ;;  %v1979_v7 = vsel %vm1801_vm7, %v1890_v30, 0.0 }
 0x31a   : > { %2131 = vperm.xlu2 %2458, %v1793_v12   ;;  %v1712_v26 = vsub.f32 1.0, %v1711_v63 }
 0x31b   : > { %v1221_v44 = vsub.f32 0.0, %v1189_v25  ;;  %vm1720_vm4 = vcmp.eq.f32.partialorder %v1719_v4, 8.507059e+37 }
 0x31c   : > { %v2585_v9 = vpop.eup %2584  ;;  %v1713_v13 = vmul.f32 %v2583_v10, %v1712_v26 }
 0x31d   : > { %v1316_v55 = vadd.f32 1.0, %v2585_v9  ;;  %v1284_v37 = vmul.f32 1.442695, %v1221_v44 }
 0x31e   : > { %v1714_v35 = vadd.f32 %v2583_v10, %v1713_v13 }
 0x31f   : > { %2586 = vrcp.f32 %v1316_v55  ;;  %v1880_v23 = vpop.permute.xlu0 %1879  ;;  %v1749_v58 = vand.u32 2147483648, %v1316_v55  ;;  %v1747_v61 = vand.u32 2147483647, %v1316_v55  ;;  %vm1743_vm6 = vweird.f32 %v1316_v55 }
 0x320   : > { %2588 = vpow2.f32 %v1284_v37  ;;  %v1977_v36 = vsel %vm1801_vm7, %v1880_v23, 0.0  ;;  %v1718_v21 = vsel %vm1717_vm2, %v2583_v10, %v1714_v35  ;;  %v2067_v38 = vpop.permute.xlu1 %2066  ;;  %v2087_v48 = vpop.permute.xlu2 %2086 }
 0x321   : > { %v2169_v1 = vsel %vm1800_vm8, %v2072_v41, %v1977_v36  ;;  %v1723_v46 = vsel %vm1720_vm4, %v1722_v54, %v1718_v21  ;;  %v2168_v5 = vsel %vm1800_vm8, %v2067_v38, %v1976_v42  ;;  %v1750_v2 = vor.u32 1.1754944e-38, %v1749_v58 }
 0x322   : > { %2201 = vst [vmem:[%s3267_s17 + $0x78] sm:$0xff] %v2169_v1  ;;  %v1794_v11 = vsub.f32 1.0, %v1723_v46  ;;  %1944 = vperm.xlu1 %2460, %v1723_v46   ;;  %1949 = vperm.xlu2 %2458, %v3509_v50   ;;  %vm1748_vm10 = vcmp.eq.f32.partialorder %v1747_v61, 8.507059e+37 }
 0x323   : > { %2200 = vst [vmem:[%s3267_s17 + $0x70] sm:$0xff] %v2168_v5 }
 0x324   : > { %2136 = vperm.xlu0 %2459, %v1794_v11  }
 0x325   : > { %v2587_v52 = vpop.eup %2586 }
 0x326   : > { %v2589_v43 = vpop.eup %2588  ;;  %v1739_v56 = vmul.f32 %v2587_v52, %v1316_v55  ;;  %vm1744_vm5 = vweird.f32 %v2587_v52 }
 0x327   : > { %v1317_v34 = vadd.f32 1.0, %v2589_v43  ;;  %vm1745_vm9 = vmor %vm1743_vm6, %vm1744_vm5 }
 0x328   : > { %v1740_v14 = vsub.f32 1.0, %v1739_v56  ;;  %v1885_v22 = vpop.permute.xlu1 %1884  ;;  %v2077_v32 = vpop.permute.xlu0 %2076 }
 0x329   : > { %2590 = vrcp.f32 %v1317_v34  ;;  %v1978_v31 = vsel %vm1801_vm7, %v1885_v22, 0.0  ;;  %v1763_v60 = vand.u32 2147483648, %v1317_v34  ;;  %v1761_v10 = vand.u32 2147483647, %v1317_v34  ;;  %v1905_v9 = vpop.permute.xlu2 %1904 }
 0x32a   : > { %v1741_v57 = vmul.f32 %v2587_v52, %v1740_v14  ;;  %v2170_v62 = vsel %vm1800_vm8, %v2077_v32, %v1978_v31  ;;  %vm1757_vm12 = vweird.f32 %v1317_v34  ;;  %v1982_v44 = vsel %vm1801_vm7, %v1905_v9, 0.0 }
 0x32b   : > { %2202 = vst [vmem:[%s3267_s17 + $0x80] sm:$0xff] %v2170_v62  ;;  %v1764_v51 = vor.u32 1.1754944e-38, %v1763_v60  ;;  %vm1762_vm14 = vcmp.eq.f32.partialorder %v1761_v10, 8.507059e+37 }
 0x32c   : > { %v1742_v33 = vadd.f32 %v2587_v52, %v1741_v57 }
 0x32e   : > { %v1746_v3 = vsel %vm1745_vm9, %v2587_v52, %v1742_v33 }
 0x32f   : > { %v2591_v45 = vpop.eup %2590  ;;  %v1751_v18 = vsel %vm1748_vm10, %v1750_v2, %v1746_v3 }
 0x330   : > { %1954 = vperm.xlu0 %2459, %v1751_v18   ;;  %v1796_v19 = vsub.f32 1.0, %v1751_v18  ;;  %v1753_v6 = vmul.f32 %v2591_v45, %v1317_v34  ;;  %v2082_v24 = vpop.permute.xlu1 %2081  ;;  %vm1758_vm11 = vweird.f32 %v2591_v45 }
 0x331   : > { %v2171_v16 = vsel %vm1800_vm8, %v2082_v24, %v1979_v7  ;;  %vm1759_vm13 = vmor %vm1757_vm12, %vm1758_vm11 }
 0x332   : > { %2146 = vperm.xlu2 %2458, %v1796_v19   ;;  %v1754_v8 = vsub.f32 1.0, %v1753_v6  ;;  %2203 = vst [vmem:[%s3267_s17 + $0x88] sm:$0xff] %v2171_v16 }
 0x334   : > { %v1755_v0 = vmul.f32 %v2591_v45, %v1754_v8 }
 0x336   : > { %v1756_v28 = vadd.f32 %v2591_v45, %v1755_v0  ;;  %v1895_v15 = vpop.permute.xlu0 %1894 }
 0x337   : > { %v1980_v17 = vsel %vm1801_vm7, %v1895_v15, 0.0 }
 0x338   : > { %v1760_v12 = vsel %vm1759_vm13, %v2591_v45, %v1756_v28  ;;  %v2172_v63 = vsel %vm1800_vm8, %v2087_v48, %v1980_v17 }
 0x339   : > { %v1765_v53 = vsel %vm1762_vm14, %v1764_v51, %v1760_v12  ;;  %2204 = vst [vmem:[%s3267_s17 + $0x90] sm:$0xff] %v2172_v63 }
 0x33a   : > { %v1797_v25 = vsub.f32 1.0, %v1765_v53  ;;  %1959 = vperm.xlu1 %2460, %v1765_v53  }
 0x33c   : > { %2151 = vperm.xlu0 %2459, %v1797_v25  }
 0x33d   : > { %v2102_v20 = vpop.permute.xlu2 %2101 }
 0x33e   : > { %v1900_v26 = vpop.permute.xlu1 %1899 }
 0x33f   : > { %v1981_v49 = vsel %vm1801_vm7, %v1900_v26, 0.0 }
 0x340   : > { %v2092_v47 = vpop.permute.xlu0 %2091 }
 0x341   : > { %v2173_v59 = vsel %vm1800_vm8, %v2092_v47, %v1981_v49 }
 0x342   : > { %2141 = vperm.xlu1 %2460, %v1795_v29   ;;  %2205 = vst [vmem:[%s3267_s17 + $0x98] sm:$0xff] %v2173_v59 }
 0x345   : > { %v1920_v41 = vpop.permute.xlu2 %1919 }
 0x346   : > { %v2097_v13 = vpop.permute.xlu1 %2096  ;;  %v1985_v36 = vsel %vm1801_vm7, %v1920_v41, 0.0 }
 0x347   : > { %v2174_v4 = vsel %vm1800_vm8, %v2097_v13, %v1982_v44 }
 0x348   : > { %2206 = vst [vmem:[%s3267_s17 + $0xa0] sm:$0xff] %v2174_v4 }
 0x353   : > { %v1910_v55 = vpop.permute.xlu0 %1909 }
 0x354   : > { %v1983_v37 = vsel %vm1801_vm7, %v1910_v55, 0.0 }
 0x355   : > { %v2175_v35 = vsel %vm1800_vm8, %v2102_v20, %v1983_v37 }
 0x356   : > { %2207 = vst [vmem:[%s3267_s17 + $0xa8] sm:$0xff] %v2175_v35 }
 0x35a   : > { %v1915_v39 = vpop.permute.xlu1 %1914 }
 0x35b   : > { %v1984_v23 = vsel %vm1801_vm7, %v1915_v39, 0.0 }
 0x35c   : > { %v2107_v54 = vpop.permute.xlu0 %2106  ;;  %v2117_v1 = vpop.permute.xlu2 %2116 }
 0x35d   : > { %v2176_v40 = vsel %vm1800_vm8, %v2107_v54, %v1984_v23 }
 0x35e   : > { %2208 = vst [vmem:[%s3267_s17 + $0xb0] sm:$0xff] %v2176_v40 }
 0x362   : > { %v2112_v21 = vpop.permute.xlu1 %2111 }
 0x363   : > { %v2177_v42 = vsel %vm1800_vm8, %v2112_v21, %v1985_v36 }
 0x364   : > { %2209 = vst [vmem:[%s3267_s17 + $0xb8] sm:$0xff] %v2177_v42  ;;  %v1935_v56 = vpop.permute.xlu2 %1934 }
 0x365   : > { %v1988_v34 = vsel %vm1801_vm7, %v1935_v56, 0.0 }
 0x372   : > { %v1925_v38 = vpop.permute.xlu0 %1924 }
 0x373   : > { %v1986_v46 = vsel %vm1801_vm7, %v1925_v38, 0.0 }
 0x374   : > { %v2178_v50 = vsel %vm1800_vm8, %v2117_v1, %v1986_v46  ;;  %v2132_v31 = vpop.permute.xlu2 %2131 }
 0x375   : > { %2210 = vst [vmem:[%s3267_s17 + $0xc0] sm:$0xff] %v2178_v50 }
 0x37c   : > { %v1930_v5 = vpop.permute.xlu1 %1929  ;;  %v1950_v30 = vpop.permute.xlu2 %1949 }
 0x37d   : > { %v1987_v11 = vsel %vm1801_vm7, %v1930_v5, 0.0  ;;  %v1991_v8 = vsel %vm1801_vm7, %v1950_v30, 0.0 }
 0x37e   : > { %v2122_v52 = vpop.permute.xlu0 %2121 }
 0x37f   : > { %v2179_v43 = vsel %vm1800_vm8, %v2122_v52, %v1987_v11 }
 0x380   : > { %2211 = vst [vmem:[%s3267_s17 + $0xc8] sm:$0xff] %v2179_v43 }
 0x384   : > { %v2127_v14 = vpop.permute.xlu1 %2126 }
 0x385   : > { %v2180_v22 = vsel %vm1800_vm8, %v2127_v14, %v1988_v34 }
 0x386   : > { %2212 = vst [vmem:[%s3267_s17 + $0xd0] sm:$0xff] %v2180_v22 }
 0x38a   : > { %v1940_v58 = vpop.permute.xlu0 %1939 }
 0x38b   : > { %v1989_v32 = vsel %vm1801_vm7, %v1940_v58, 0.0 }
 0x38c   : > { %v2181_v57 = vsel %vm1800_vm8, %v2132_v31, %v1989_v32  ;;  %v2147_v45 = vpop.permute.xlu2 %2146 }
 0x38d   : > { %2213 = vst [vmem:[%s3267_s17 + $0xd8] sm:$0xff] %v2181_v57 }
 0x394   : > { %v1945_v61 = vpop.permute.xlu1 %1944 }
 0x395   : > { %v1990_v62 = vsel %vm1801_vm7, %v1945_v61, 0.0 }
 0x396   : > { %v2137_v33 = vpop.permute.xlu0 %2136 }
 0x397   : > { %v2182_v2 = vsel %vm1800_vm8, %v2137_v33, %v1990_v62 }
 0x398   : > { %2214 = vst [vmem:[%s3267_s17 + $0xe0] sm:$0xff] %v2182_v2 }
 0x3a2   : > { %v1955_v3 = vpop.permute.xlu0 %1954 }
 0x3a3   : > { %v1992_v18 = vsel %vm1801_vm7, %v1955_v3, 0.0 }
 0x3a4   : > { %v2184_v19 = vsel %vm1800_vm8, %v2147_v45, %v1992_v18 }
 0x3a5   : > { %2216 = vst [vmem:[%s3267_s17 + $0xf0] sm:$0xff] %v2184_v19 }
 0x3ac   : > { %v1960_v6 = vpop.permute.xlu1 %1959 }
 0x3ad   : > { %v1993_v7 = vsel %vm1801_vm7, %v1960_v6, 0.0 }
 0x3ae   : > { %v2152_v24 = vpop.permute.xlu0 %2151 }
 0x3af   : > { %v2185_v16 = vsel %vm1800_vm8, %v2152_v24, %v1993_v7 }
 0x3b0   : > { %2217 = vst [vmem:[%s3267_s17 + $0xf8] sm:$0xff] %v2185_v16 }
 0x3b4   : > { %v2142_v60 = vpop.permute.xlu1 %2141 }
 0x3b5   : > { %v2183_v0 = vsel %vm1800_vm8, %v2142_v60, %v1991_v8 }
 0x3b6   : > { %2215 = vst [vmem:[%s3267_s17 + $0xe8] sm:$0xff] %v2183_v0 }
 0x3b7   : > { %2620 = shalt.err (!%p2617_p3)
}
 0x3b8   : > { %s2659_s15 = smov 128   ;;  %s2660_s17 = smov 8  }
 0x3b9   : > { %2415 = dma.vmem_to_hbm [thread:$0]  (%p2739_p5), %s2232_s29, 4096, %s2234_s8, %s2219_s28, %s2659_s15, %s2659_s15, %s2660_s17  }
 0x3ba PF: > { %p2421_p4 = scmp.ge.s32.totalorder %s2655_s27, 2  ;;  %s2248_s21 = sand.u32 1, %s2643_s24  }
 0x3bb   : > { %s2249_s22 = scalar_lea.sflag [#allocation3], %s2248_s21 }
 0x3bc   : > { %p2418_p7 = pnand %p2421_p4, %p2743_p6 }
 0x3be   : > { %p2419_p8 = pneg %p2418_p7 }
 0x3c0   : > { %2638 = dma.done.wait (%p2419_p8), %s2249_s22, 4096  }
 0x3c1   : > { %2640 = vsyncadd (%p2419_p8), %s2249_s22, 4294963200  ;;  %p17_p9 = scmp.ge.s32.totalorder %s2726_s30, 4   ;;  %s3651_s24 = smov %s2647_s25 }
 0x3c2   : > { %s3652_s25 = smov %s2651_s26  ;;  %s3653_s26 = smov %s2737_s10 }
 0x3c3   : > { %s3654_s27 = smov %s2726_s30  ;;  %19 = sbr.rel (!%p17_p9) target bundleno = 3 (0x3), region = 83 }
 0x3c8   :  { %2255 = vsyncpa [#allocation3], 1 }
 0x3c9   :  { %2257 = vsyncpa [#allocation3 + $0x1], 1 }

</bundles_post_ra>
